<compile_context>
chip_gen: v7x
topology: tpu7x:2x2x1
jax: 0.10.0
libtpu: 0.0.40
codegen_flags: <defaults>
</compile_context>

<pallas_src>
import jax
import jax.numpy as jnp
from jax.experimental import pallas as pl
from jax.experimental.pallas import tpu as pltpu


def _conv3x3(xpad, w_ref, b_ref):
    """3x3 'same' conv over a row tile.

    xpad:  (R + 2, W, C) f32 value; row p corresponds to output row p - 1 (one
           halo row per side, already zeroed where it falls outside the image).
           Zero padding along W is produced with pltpu.roll + a one-column mask.
    w_ref: (3, 3, C, C) HWIO weight ref.   b_ref: (1, C) bias ref.
    Returns (R, W, C) f32 = conv + bias (no activation).
    """
    Rp2, W, C = xpad.shape
    R = Rp2 - 2
    col = jax.lax.broadcasted_iota(jnp.int32, (1, W, 1), 1)

    # dx = -1, 0, +1 column shifts; merge (rows, W) once per shift so each tap is
    # a plain 2-D matmul (no per-tap slice+reshape relayouts).
    shifted = []
    for dx in (-1, 0, 1):
        if dx == 0:
            s = xpad
        else:
            s = pltpu.roll(xpad, shift=(-dx) % W, axis=1)     # s[:, j] = xpad[:, j + dx]
            edge = W - 1 if dx == 1 else 0                    # wrapped-around column -> 0
            s = s * (col != edge).astype(jnp.float32)
        shifted.append(s.reshape(Rp2 * W, C))

    acc = jnp.zeros((R * W, C), jnp.float32)
    for ky in range(3):
        lo = ky * W
        for kx in range(3):
            acc = acc + jnp.dot(shifted[kx][lo:lo + R * W], w_ref[ky, kx],
                                preferred_element_type=jnp.float32)
    return (acc + b_ref[...]).reshape(R, W, C)


def _make_rcu_kernel(H):
    def rcu_kernel(xm_ref, xt0_ref, xt1_ref, xb0_ref, xb1_ref,
                   w1_ref, b1_ref, w2_ref, b2_ref, out_ref):
        TH, W, C = xm_ref.shape
        t = pl.program_id(1)
        r0 = t * TH                                   # first output row of this tile
        f32 = jnp.float32

        # Assemble the (TH + 4)-row input tile: 2 clamped halo rows per side,
        # zeroed here when they fall outside the image (conv1's zero padding).
        top0 = xt0_ref[...].astype(f32) * (r0 >= 2).astype(f32)           # row r0 - 2
        top1 = xt1_ref[...].astype(f32) * (r0 >= 1).astype(f32)           # row r0 - 1
        bot0 = xb0_ref[...].astype(f32) * (r0 + TH < H).astype(f32)       # row r0 + TH
        bot1 = xb1_ref[...].astype(f32) * (r0 + TH + 1 < H).astype(f32)   # row r0 + TH + 1
        xm = xm_ref[...].astype(f32)                                      # rows [r0, r0 + TH)
        xpad = jnp.concatenate([top0, top1, xm, bot0, bot1], axis=0)      # (TH + 4, W, C)

        # conv1 + ReLU on TH + 2 rows (one extra row per side feeds conv2).
        y1 = jnp.maximum(_conv3x3(xpad, w1_ref, b1_ref), 0.0)             # rows [r0-1, r0+TH+1)

        # Rows of y1 outside the image must be conv2's zero padding (not relu(bias)).
        y1_first = y1[0:1] * (r0 >= 1).astype(f32)
        y1_last = y1[TH + 1:TH + 2] * (r0 + TH < H).astype(f32)
        y1 = jnp.concatenate([y1_first, y1[1:TH + 1], y1_last], axis=0)

        # conv2 + ReLU on the TH output rows.
        y2 = jnp.maximum(_conv3x3(y1, w2_ref, b2_ref), 0.0)               # (TH, W, C)

        # Residual add: re-read the x tile right before the add (short live range).
        out_ref[...] = (y2 + xm_ref[...].astype(f32)).astype(out_ref.dtype)

    return rcu_kernel


def _pick_tile_rows(H, W, C, budget_bytes=4 * 1024 * 1024):
    """Largest divisor of H whose rough per-step f32 working set fits the budget
    (keeps every grid step well under the default scoped-VMEM limit on all chips)."""
    best = 1
    for th in range(1, H + 1):
        if H % th:
            continue
        work = 8 * (th + 4) * W * C * 4   # tile + shifted copies + accumulators + y1 + out
        if work <= budget_bytes:
            best = th
    return best


def residual_conv_unit(x_nchw, w1_hwio, b1, w2_hwio, b2, *, tile_rows=None):
    """x_nchw: (N, C, H, W); w*_hwio: (3, 3, C, C); b*: (C,). Returns (N, C, H, W)."""
    N, C, H, W = x_nchw.shape
    TH = _pick_tile_rows(H, W, C) if tile_rows is None else tile_rows
    assert H % TH == 0, "tile_rows must divide H"
    n_row_tiles = H // TH

    x_nhwc = jnp.transpose(x_nchw, (0, 2, 3, 1))     # NHWC; no spatial padding in HBM

    def row_spec(row_of_t):
        # 1-row halo block: block size 1 along H => block index == row index.
        return pl.BlockSpec((None, 1, W, C), lambda n, t: (n, row_of_t(t), 0, 0))

    in_specs = [
        # main tile: rows [t*TH, (t+1)*TH)
        pl.BlockSpec((None, TH, W, C), lambda n, t: (n, t, 0, 0)),
        # halo rows, clamped at the image border (zeroed in-kernel when out of range)
        row_spec(lambda t: jnp.maximum(t * TH - 2, 0)),
        row_spec(lambda t: jnp.maximum(t * TH - 1, 0)),
        row_spec(lambda t: jnp.minimum(t * TH + TH, H - 1)),
        row_spec(lambda t: jnp.minimum(t * TH + TH + 1, H - 1)),
        # weights / biases: constant index map -> fetched once, resident in VMEM
        pl.BlockSpec((3, 3, C, C), lambda n, t: (0, 0, 0, 0)),
        pl.BlockSpec((1, C), lambda n, t: (0, 0)),
        pl.BlockSpec((3, 3, C, C), lambda n, t: (0, 0, 0, 0)),
        pl.BlockSpec((1, C), lambda n, t: (0, 0)),
    ]

    out_nhwc = pl.pallas_call(
        _make_rcu_kernel(H),
        out_shape=jax.ShapeDtypeStruct((N, H, W, C), x_nchw.dtype),
        grid=(N, n_row_tiles),
        in_specs=in_specs,
        out_specs=pl.BlockSpec((None, TH, W, C), lambda n, t: (n, t, 0, 0)),
        compiler_params=pltpu.CompilerParams(
            dimension_semantics=("parallel", "parallel")),
    )(x_nhwc, x_nhwc, x_nhwc, x_nhwc, x_nhwc,
      w1_hwio, b1.reshape(1, C), w2_hwio, b2.reshape(1, C))

    return jnp.transpose(out_nhwc, (0, 3, 1, 2))     # back to NCHW


def _reference(x_nchw, w1_oihw, b1, w2_oihw, b2):
    """Pure-JAX reference matching PyTorch Conv2d(pad=1) -> ReLU -> Conv2d -> ReLU, + x."""
    dn = ("NCHW", "OIHW", "NCHW")
    y = jax.lax.conv_general_dilated(x_nchw, w1_oihw, (1, 1), "SAME",
                                     dimension_numbers=dn)
    y = jax.nn.relu(y + b1[None, :, None, None])
    y = jax.lax.conv_general_dilated(y, w2_oihw, (1, 1), "SAME",
                                     dimension_numbers=dn)
    y = jax.nn.relu(y + b2[None, :, None, None])
    return y + x_nchw


if __name__ == "__main__":
    N, C, H, W = 2, 4, 16, 16

    key = jax.random.PRNGKey(0)
    kx_, kw1, kb1, kw2, kb2 = jax.random.split(key, 5)

    bound = 1.0 / jnp.sqrt(jnp.float32(C * 3 * 3))
    x = jax.random.normal(kx_, (N, C, H, W), jnp.float32)
    w1_oihw = jax.random.uniform(kw1, (C, C, 3, 3), jnp.float32, -bound, bound)
    b1 = jax.random.uniform(kb1, (C,), jnp.float32, -bound, bound)
    w2_oihw = jax.random.uniform(kw2, (C, C, 3, 3), jnp.float32, -bound, bound)
    b2 = jax.random.uniform(kb2, (C,), jnp.float32, -bound, bound)

    # OIHW -> HWIO for the kernel.
    w1_hwio = jnp.transpose(w1_oihw, (2, 3, 1, 0))
    w2_hwio = jnp.transpose(w2_oihw, (2, 3, 1, 0))

    ref = _reference(x, w1_oihw, b1, w2_oihw, b2)

    # Multi-tile path: grid = (batch, row-tiles) = (2, 2); exercises the halo /
    # cross-tile conv boundary logic.
    out = residual_conv_unit(x, w1_hwio, b1, w2_hwio, b2, tile_rows=8)
    out = jax.block_until_ready(out)
    assert out.shape == (N, C, H, W)
    assert jnp.allclose(out, ref, atol=1e-5, rtol=1e-5), "mismatch vs reference (tiled)"

    # Auto tile selection (whole image per step at this small size).
    out2 = residual_conv_unit(x, w1_hwio, b1, w2_hwio, b2)
    out2 = jax.block_until_ready(out2)
    assert jnp.allclose(out2, ref, atol=1e-5, rtol=1e-5), "mismatch vs reference (auto tile)"

    print("KERNEL_OK")
</pallas_src>

<mosaic_0001>
module attributes {stable_mosaic.version = 11 : i64} {
  func.func @rcu_kernel(%arg0: i32, %arg1: i32, %arg2: memref<1x8x16x4xf32, #tpu.memory_space<vmem>>, %arg3: memref<1x1x16x4xf32, #tpu.memory_space<vmem>>, %arg4: memref<1x1x16x4xf32, #tpu.memory_space<vmem>>, %arg5: memref<1x1x16x4xf32, #tpu.memory_space<vmem>>, %arg6: memref<1x1x16x4xf32, #tpu.memory_space<vmem>>, %arg7: memref<3x3x4x4xf32, #tpu.memory_space<vmem>>, %arg8: memref<1x4xf32, #tpu.memory_space<vmem>>, %arg9: memref<3x3x4x4xf32, #tpu.memory_space<vmem>>, %arg10: memref<1x4xf32, #tpu.memory_space<vmem>>, %arg11: memref<1x8x16x4xf32, #tpu.memory_space<vmem>>) attributes {dimension_semantics = [#tpu.dimension_semantics<parallel>, #tpu.dimension_semantics<parallel>], iteration_bounds = array<i64: 2, 2>, scalar_prefetch = 0 : i64, scratch_operands = 0 : i64, tpu.core_type = #tpu.core_type<tc>, window_params = [{transform_indices = @transform_0, window_bounds = array<i64: 1, 8, 16, 4>}, {transform_indices = @transform_1, window_bounds = array<i64: 1, 1, 16, 4>}, {transform_indices = @transform_2, window_bounds = array<i64: 1, 1, 16, 4>}, {transform_indices = @transform_3, window_bounds = array<i64: 1, 1, 16, 4>}, {transform_indices = @transform_4, window_bounds = array<i64: 1, 1, 16, 4>}, {pipeline_mode = #tpu.pipeline_mode<synchronous>, transform_indices = @transform_5, window_bounds = array<i64: 3, 3, 4, 4>}, {pipeline_mode = #tpu.pipeline_mode<synchronous>, transform_indices = @transform_6, window_bounds = array<i64: 1, 4>}, {pipeline_mode = #tpu.pipeline_mode<synchronous>, transform_indices = @transform_7, window_bounds = array<i64: 3, 3, 4, 4>}, {pipeline_mode = #tpu.pipeline_mode<synchronous>, transform_indices = @transform_8, window_bounds = array<i64: 1, 4>}, {transform_indices = @transform_9, window_bounds = array<i64: 1, 8, 16, 4>}]} {
    %c8_i32 = arith.constant 8 : i32
    %0 = arith.muli %arg1, %c8_i32 : i32
    %c0 = arith.constant 0 : index
    %c0_0 = arith.constant 0 : index
    %c0_1 = arith.constant 0 : index
    %c0_2 = arith.constant 0 : index
    %1 = vector.load %arg3[%c0, %c0_0, %c0_1, %c0_2] : memref<1x1x16x4xf32, #tpu.memory_space<vmem>>, vector<1x1x16x4xf32>
    %2 = vector.shape_cast %1 : vector<1x1x16x4xf32> to vector<1x16x4xf32>
    %c2_i32 = arith.constant 2 : i32
    %3 = arith.cmpi sge, %0, %c2_i32 : i32
    %4 = arith.extui %3 : i1 to i32
    %5 = arith.sitofp %4 : i32 to f32
    %6 = vector.broadcast %5 : f32 to vector<1x16x4xf32>
    %7 = arith.mulf %2, %6 : vector<1x16x4xf32>
    %c0_3 = arith.constant 0 : index
    %c0_4 = arith.constant 0 : index
    %c0_5 = arith.constant 0 : index
    %c0_6 = arith.constant 0 : index
    %8 = vector.load %arg4[%c0_3, %c0_4, %c0_5, %c0_6] : memref<1x1x16x4xf32, #tpu.memory_space<vmem>>, vector<1x1x16x4xf32>
    %9 = vector.shape_cast %8 : vector<1x1x16x4xf32> to vector<1x16x4xf32>
    %c1_i32 = arith.constant 1 : i32
    %10 = arith.cmpi sge, %0, %c1_i32 : i32
    %11 = arith.extui %10 : i1 to i32
    %12 = arith.sitofp %11 : i32 to f32
    %13 = vector.broadcast %12 : f32 to vector<1x16x4xf32>
    %14 = arith.mulf %9, %13 : vector<1x16x4xf32>
    %c0_7 = arith.constant 0 : index
    %c0_8 = arith.constant 0 : index
    %c0_9 = arith.constant 0 : index
    %c0_10 = arith.constant 0 : index
    %15 = vector.load %arg5[%c0_7, %c0_8, %c0_9, %c0_10] : memref<1x1x16x4xf32, #tpu.memory_space<vmem>>, vector<1x1x16x4xf32>
    %16 = vector.shape_cast %15 : vector<1x1x16x4xf32> to vector<1x16x4xf32>
    %c8_i32_11 = arith.constant 8 : i32
    %17 = arith.addi %0, %c8_i32_11 : i32
    %c16_i32 = arith.constant 16 : i32
    %18 = arith.cmpi slt, %17, %c16_i32 : i32
    %19 = arith.extui %18 : i1 to i32
    %20 = arith.sitofp %19 : i32 to f32
    %21 = vector.broadcast %20 : f32 to vector<1x16x4xf32>
    %22 = arith.mulf %16, %21 : vector<1x16x4xf32>
    %c0_12 = arith.constant 0 : index
    %c0_13 = arith.constant 0 : index
    %c0_14 = arith.constant 0 : index
    %c0_15 = arith.constant 0 : index
    %23 = vector.load %arg6[%c0_12, %c0_13, %c0_14, %c0_15] : memref<1x1x16x4xf32, #tpu.memory_space<vmem>>, vector<1x1x16x4xf32>
    %24 = vector.shape_cast %23 : vector<1x1x16x4xf32> to vector<1x16x4xf32>
    %c8_i32_16 = arith.constant 8 : i32
    %25 = arith.addi %0, %c8_i32_16 : i32
    %c1_i32_17 = arith.constant 1 : i32
    %26 = arith.addi %25, %c1_i32_17 : i32
    %c16_i32_18 = arith.constant 16 : i32
    %27 = arith.cmpi slt, %26, %c16_i32_18 : i32
    %28 = arith.extui %27 : i1 to i32
    %29 = arith.sitofp %28 : i32 to f32
    %30 = vector.broadcast %29 : f32 to vector<1x16x4xf32>
    %31 = arith.mulf %24, %30 : vector<1x16x4xf32>
    %c0_19 = arith.constant 0 : index
    %c0_20 = arith.constant 0 : index
    %c0_21 = arith.constant 0 : index
    %c0_22 = arith.constant 0 : index
    %32 = vector.load %arg2[%c0_19, %c0_20, %c0_21, %c0_22] : memref<1x8x16x4xf32, #tpu.memory_space<vmem>>, vector<1x8x16x4xf32>
    %33 = vector.shape_cast %32 : vector<1x8x16x4xf32> to vector<8x16x4xf32>
    %34 = tpu.concatenate %7, %14, %33, %22, %31 in 0 : vector<1x16x4xf32>, vector<1x16x4xf32>, vector<8x16x4xf32>, vector<1x16x4xf32>, vector<1x16x4xf32> -> vector<12x16x4xf32>
    %35 = tpu.iota {dimensions = array<i32: 1>} : vector<1x16x1xi32>
    %c1_i32_23 = arith.constant 1 : i32
    %36 = tpu.dynamic_rotate %34 by %c1_i32_23 dim 1 : vector<12x16x4xf32>, i32 -> vector<12x16x4xf32>
    %c0_i32 = arith.constant 0 : i32
    %37 = vector.broadcast %c0_i32 : i32 to vector<1x16x1xi32>
    %38 = arith.cmpi ne, %35, %37 : vector<1x16x1xi32>
    %39 = arith.extui %38 : vector<1x16x1xi1> to vector<1x16x1xi32>
    %40 = arith.sitofp %39 : vector<1x16x1xi32> to vector<1x16x1xf32>
    %41 = vector.broadcast %40 : vector<1x16x1xf32> to vector<12x16x4xf32>
    %42 = arith.mulf %36, %41 : vector<12x16x4xf32>
    %43 = vector.shape_cast %42 : vector<12x16x4xf32> to vector<192x4xf32>
    %44 = vector.shape_cast %34 : vector<12x16x4xf32> to vector<192x4xf32>
    %c15_i32 = arith.constant 15 : i32
    %45 = tpu.dynamic_rotate %34 by %c15_i32 dim 1 : vector<12x16x4xf32>, i32 -> vector<12x16x4xf32>
    %c15_i32_24 = arith.constant 15 : i32
    %46 = vector.broadcast %c15_i32_24 : i32 to vector<1x16x1xi32>
    %47 = arith.cmpi ne, %35, %46 : vector<1x16x1xi32>
    %48 = arith.extui %47 : vector<1x16x1xi1> to vector<1x16x1xi32>
    %49 = arith.sitofp %48 : vector<1x16x1xi32> to vector<1x16x1xf32>
    %50 = vector.broadcast %49 : vector<1x16x1xf32> to vector<12x16x4xf32>
    %51 = arith.mulf %45, %50 : vector<12x16x4xf32>
    %52 = vector.shape_cast %51 : vector<12x16x4xf32> to vector<192x4xf32>
    %cst = arith.constant 0.000000e+00 : f32
    %53 = vector.broadcast %cst : f32 to vector<160x4xf32>
    %54 = vector.extract_strided_slice %43 {offsets = [0, 0], sizes = [160, 4], strides = [1, 1]} : vector<192x4xf32> to vector<160x4xf32>
    %c0_25 = arith.constant 0 : index
    %c0_26 = arith.constant 0 : index
    %c0_27 = arith.constant 0 : index
    %c0_28 = arith.constant 0 : index
    %55 = vector.load %arg7[%c0_25, %c0_26, %c0_27, %c0_28] : memref<3x3x4x4xf32, #tpu.memory_space<vmem>>, vector<1x1x4x4xf32>
    %56 = vector.shape_cast %55 : vector<1x1x4x4xf32> to vector<4x4xf32>
    %cst_29 = arith.constant dense<0.000000e+00> : vector<160x4xf32>
    %57 = tpu.matmul %54, %56, %cst_29 {dimension_numbers = #tpu.dot_dimension_numbers<[1], [0], [0], [1], [0, 0, 1, 1], [], []>} : vector<160x4xf32>, vector<4x4xf32>, vector<160x4xf32> -> vector<160x4xf32>
    %58 = arith.addf %53, %57 : vector<160x4xf32>
    %59 = vector.extract_strided_slice %44 {offsets = [0, 0], sizes = [160, 4], strides = [1, 1]} : vector<192x4xf32> to vector<160x4xf32>
    %c0_30 = arith.constant 0 : index
    %c1 = arith.constant 1 : index
    %c0_31 = arith.constant 0 : index
    %c0_32 = arith.constant 0 : index
    %60 = vector.load %arg7[%c0_30, %c1, %c0_31, %c0_32] : memref<3x3x4x4xf32, #tpu.memory_space<vmem>>, vector<1x1x4x4xf32>
    %61 = vector.shape_cast %60 : vector<1x1x4x4xf32> to vector<4x4xf32>
    %cst_33 = arith.constant dense<0.000000e+00> : vector<160x4xf32>
    %62 = tpu.matmul %59, %61, %cst_33 {dimension_numbers = #tpu.dot_dimension_numbers<[1], [0], [0], [1], [0, 0, 1, 1], [], []>} : vector<160x4xf32>, vector<4x4xf32>, vector<160x4xf32> -> vector<160x4xf32>
    %63 = arith.addf %58, %62 : vector<160x4xf32>
    %64 = vector.extract_strided_slice %52 {offsets = [0, 0], sizes = [160, 4], strides = [1, 1]} : vector<192x4xf32> to vector<160x4xf32>
    %c0_34 = arith.constant 0 : index
    %c2 = arith.constant 2 : index
    %c0_35 = arith.constant 0 : index
    %c0_36 = arith.constant 0 : index
    %65 = vector.load %arg7[%c0_34, %c2, %c0_35, %c0_36] : memref<3x3x4x4xf32, #tpu.memory_space<vmem>>, vector<1x1x4x4xf32>
    %66 = vector.shape_cast %65 : vector<1x1x4x4xf32> to vector<4x4xf32>
    %cst_37 = arith.constant dense<0.000000e+00> : vector<160x4xf32>
    %67 = tpu.matmul %64, %66, %cst_37 {dimension_numbers = #tpu.dot_dimension_numbers<[1], [0], [0], [1], [0, 0, 1, 1], [], []>} : vector<160x4xf32>, vector<4x4xf32>, vector<160x4xf32> -> vector<160x4xf32>
    %68 = arith.addf %63, %67 : vector<160x4xf32>
    %69 = vector.extract_strided_slice %43 {offsets = [16, 0], sizes = [160, 4], strides = [1, 1]} : vector<192x4xf32> to vector<160x4xf32>
    %c1_38 = arith.constant 1 : index
    %c0_39 = arith.constant 0 : index
    %c0_40 = arith.constant 0 : index
    %c0_41 = arith.constant 0 : index
    %70 = vector.load %arg7[%c1_38, %c0_39, %c0_40, %c0_41] : memref<3x3x4x4xf32, #tpu.memory_space<vmem>>, vector<1x1x4x4xf32>
    %71 = vector.shape_cast %70 : vector<1x1x4x4xf32> to vector<4x4xf32>
    %cst_42 = arith.constant dense<0.000000e+00> : vector<160x4xf32>
    %72 = tpu.matmul %69, %71, %cst_42 {dimension_numbers = #tpu.dot_dimension_numbers<[1], [0], [0], [1], [0, 0, 1, 1], [], []>} : vector<160x4xf32>, vector<4x4xf32>, vector<160x4xf32> -> vector<160x4xf32>
    %73 = arith.addf %68, %72 : vector<160x4xf32>
    %74 = vector.extract_strided_slice %44 {offsets = [16, 0], sizes = [160, 4], strides = [1, 1]} : vector<192x4xf32> to vector<160x4xf32>
    %c1_43 = arith.constant 1 : index
    %c1_44 = arith.constant 1 : index
    %c0_45 = arith.constant 0 : index
    %c0_46 = arith.constant 0 : index
    %75 = vector.load %arg7[%c1_43, %c1_44, %c0_45, %c0_46] : memref<3x3x4x4xf32, #tpu.memory_space<vmem>>, vector<1x1x4x4xf32>
    %76 = vector.shape_cast %75 : vector<1x1x4x4xf32> to vector<4x4xf32>
    %cst_47 = arith.constant dense<0.000000e+00> : vector<160x4xf32>
    %77 = tpu.matmul %74, %76, %cst_47 {dimension_numbers = #tpu.dot_dimension_numbers<[1], [0], [0], [1], [0, 0, 1, 1], [], []>} : vector<160x4xf32>, vector<4x4xf32>, vector<160x4xf32> -> vector<160x4xf32>
    %78 = arith.addf %73, %77 : vector<160x4xf32>
    %79 = vector.extract_strided_slice %52 {offsets = [16, 0], sizes = [160, 4], strides = [1, 1]} : vector<192x4xf32> to vector<160x4xf32>
    %c1_48 = arith.constant 1 : index
    %c2_49 = arith.constant 2 : index
    %c0_50 = arith.constant 0 : index
    %c0_51 = arith.constant 0 : index
    %80 = vector.load %arg7[%c1_48, %c2_49, %c0_50, %c0_51] : memref<3x3x4x4xf32, #tpu.memory_space<vmem>>, vector<1x1x4x4xf32>
    %81 = vector.shape_cast %80 : vector<1x1x4x4xf32> to vector<4x4xf32>
    %cst_52 = arith.constant dense<0.000000e+00> : vector<160x4xf32>
    %82 = tpu.matmul %79, %81, %cst_52 {dimension_numbers = #tpu.dot_dimension_numbers<[1], [0], [0], [1], [0, 0, 1, 1], [], []>} : vector<160x4xf32>, vector<4x4xf32>, vector<160x4xf32> -> vector<160x4xf32>
    %83 = arith.addf %78, %82 : vector<160x4xf32>
    %84 = vector.extract_strided_slice %43 {offsets = [32, 0], sizes = [160, 4], strides = [1, 1]} : vector<192x4xf32> to vector<160x4xf32>
    %c2_53 = arith.constant 2 : index
    %c0_54 = arith.constant 0 : index
    %c0_55 = arith.constant 0 : index
    %c0_56 = arith.constant 0 : index
    %85 = vector.load %arg7[%c2_53, %c0_54, %c0_55, %c0_56] : memref<3x3x4x4xf32, #tpu.memory_space<vmem>>, vector<1x1x4x4xf32>
    %86 = vector.shape_cast %85 : vector<1x1x4x4xf32> to vector<4x4xf32>
    %cst_57 = arith.constant dense<0.000000e+00> : vector<160x4xf32>
    %87 = tpu.matmul %84, %86, %cst_57 {dimension_numbers = #tpu.dot_dimension_numbers<[1], [0], [0], [1], [0, 0, 1, 1], [], []>} : vector<160x4xf32>, vector<4x4xf32>, vector<160x4xf32> -> vector<160x4xf32>
    %88 = arith.addf %83, %87 : vector<160x4xf32>
    %89 = vector.extract_strided_slice %44 {offsets = [32, 0], sizes = [160, 4], strides = [1, 1]} : vector<192x4xf32> to vector<160x4xf32>
    %c2_58 = arith.constant 2 : index
    %c1_59 = arith.constant 1 : index
    %c0_60 = arith.constant 0 : index
    %c0_61 = arith.constant 0 : index
    %90 = vector.load %arg7[%c2_58, %c1_59, %c0_60, %c0_61] : memref<3x3x4x4xf32, #tpu.memory_space<vmem>>, vector<1x1x4x4xf32>
    %91 = vector.shape_cast %90 : vector<1x1x4x4xf32> to vector<4x4xf32>
    %cst_62 = arith.constant dense<0.000000e+00> : vector<160x4xf32>
    %92 = tpu.matmul %89, %91, %cst_62 {dimension_numbers = #tpu.dot_dimension_numbers<[1], [0], [0], [1], [0, 0, 1, 1], [], []>} : vector<160x4xf32>, vector<4x4xf32>, vector<160x4xf32> -> vector<160x4xf32>
    %93 = arith.addf %88, %92 : vector<160x4xf32>
    %94 = vector.extract_strided_slice %52 {offsets = [32, 0], sizes = [160, 4], strides = [1, 1]} : vector<192x4xf32> to vector<160x4xf32>
    %c2_63 = arith.constant 2 : index
    %c2_64 = arith.constant 2 : index
    %c0_65 = arith.constant 0 : index
    %c0_66 = arith.constant 0 : index
    %95 = vector.load %arg7[%c2_63, %c2_64, %c0_65, %c0_66] : memref<3x3x4x4xf32, #tpu.memory_space<vmem>>, vector<1x1x4x4xf32>
    %96 = vector.shape_cast %95 : vector<1x1x4x4xf32> to vector<4x4xf32>
    %cst_67 = arith.constant dense<0.000000e+00> : vector<160x4xf32>
    %97 = tpu.matmul %94, %96, %cst_67 {dimension_numbers = #tpu.dot_dimension_numbers<[1], [0], [0], [1], [0, 0, 1, 1], [], []>} : vector<160x4xf32>, vector<4x4xf32>, vector<160x4xf32> -> vector<160x4xf32>
    %98 = arith.addf %93, %97 : vector<160x4xf32>
    %c0_68 = arith.constant 0 : index
    %c0_69 = arith.constant 0 : index
    %99 = vector.load %arg8[%c0_68, %c0_69] : memref<1x4xf32, #tpu.memory_space<vmem>>, vector<1x4xf32>
    %100 = vector.broadcast %99 : vector<1x4xf32> to vector<160x4xf32>
    %101 = arith.addf %98, %100 : vector<160x4xf32>
    %102 = vector.shape_cast %101 : vector<160x4xf32> to vector<10x16x4xf32>
    %cst_70 = arith.constant 0.000000e+00 : f32
    %103 = vector.broadcast %cst_70 : f32 to vector<10x16x4xf32>
    %104 = arith.maximumf %102, %103 : vector<10x16x4xf32>
    %105 = vector.extract_strided_slice %104 {offsets = [0, 0, 0], sizes = [1, 16, 4], strides = [1, 1, 1]} : vector<10x16x4xf32> to vector<1x16x4xf32>
    %c1_i32_71 = arith.constant 1 : i32
    %106 = arith.cmpi sge, %0, %c1_i32_71 : i32
    %107 = arith.extui %106 : i1 to i32
    %108 = arith.sitofp %107 : i32 to f32
    %109 = vector.broadcast %108 : f32 to vector<1x16x4xf32>
    %110 = arith.mulf %105, %109 : vector<1x16x4xf32>
    %111 = vector.extract_strided_slice %104 {offsets = [9, 0, 0], sizes = [1, 16, 4], strides = [1, 1, 1]} : vector<10x16x4xf32> to vector<1x16x4xf32>
    %c8_i32_72 = arith.constant 8 : i32
    %112 = arith.addi %0, %c8_i32_72 : i32
    %c16_i32_73 = arith.constant 16 : i32
    %113 = arith.cmpi slt, %112, %c16_i32_73 : i32
    %114 = arith.extui %113 : i1 to i32
    %115 = arith.sitofp %114 : i32 to f32
    %116 = vector.broadcast %115 : f32 to vector<1x16x4xf32>
    %117 = arith.mulf %111, %116 : vector<1x16x4xf32>
    %118 = vector.extract_strided_slice %104 {offsets = [1, 0, 0], sizes = [8, 16, 4], strides = [1, 1, 1]} : vector<10x16x4xf32> to vector<8x16x4xf32>
    %119 = tpu.concatenate %110, %118, %117 in 0 : vector<1x16x4xf32>, vector<8x16x4xf32>, vector<1x16x4xf32> -> vector<10x16x4xf32>
    %120 = tpu.iota {dimensions = array<i32: 1>} : vector<1x16x1xi32>
    %c1_i32_74 = arith.constant 1 : i32
    %121 = tpu.dynamic_rotate %119 by %c1_i32_74 dim 1 : vector<10x16x4xf32>, i32 -> vector<10x16x4xf32>
    %c0_i32_75 = arith.constant 0 : i32
    %122 = vector.broadcast %c0_i32_75 : i32 to vector<1x16x1xi32>
    %123 = arith.cmpi ne, %120, %122 : vector<1x16x1xi32>
    %124 = arith.extui %123 : vector<1x16x1xi1> to vector<1x16x1xi32>
    %125 = arith.sitofp %124 : vector<1x16x1xi32> to vector<1x16x1xf32>
    %126 = vector.broadcast %125 : vector<1x16x1xf32> to vector<10x16x4xf32>
    %127 = arith.mulf %121, %126 : vector<10x16x4xf32>
    %128 = vector.shape_cast %127 : vector<10x16x4xf32> to vector<160x4xf32>
    %129 = vector.shape_cast %119 : vector<10x16x4xf32> to vector<160x4xf32>
    %c15_i32_76 = arith.constant 15 : i32
    %130 = tpu.dynamic_rotate %119 by %c15_i32_76 dim 1 : vector<10x16x4xf32>, i32 -> vector<10x16x4xf32>
    %c15_i32_77 = arith.constant 15 : i32
    %131 = vector.broadcast %c15_i32_77 : i32 to vector<1x16x1xi32>
    %132 = arith.cmpi ne, %120, %131 : vector<1x16x1xi32>
    %133 = arith.extui %132 : vector<1x16x1xi1> to vector<1x16x1xi32>
    %134 = arith.sitofp %133 : vector<1x16x1xi32> to vector<1x16x1xf32>
    %135 = vector.broadcast %134 : vector<1x16x1xf32> to vector<10x16x4xf32>
    %136 = arith.mulf %130, %135 : vector<10x16x4xf32>
    %137 = vector.shape_cast %136 : vector<10x16x4xf32> to vector<160x4xf32>
    %cst_78 = arith.constant 0.000000e+00 : f32
    %138 = vector.broadcast %cst_78 : f32 to vector<128x4xf32>
    %139 = vector.extract_strided_slice %128 {offsets = [0, 0], sizes = [128, 4], strides = [1, 1]} : vector<160x4xf32> to vector<128x4xf32>
    %c0_79 = arith.constant 0 : index
    %c0_80 = arith.constant 0 : index
    %c0_81 = arith.constant 0 : index
    %c0_82 = arith.constant 0 : index
    %140 = vector.load %arg9[%c0_79, %c0_80, %c0_81, %c0_82] : memref<3x3x4x4xf32, #tpu.memory_space<vmem>>, vector<1x1x4x4xf32>
    %141 = vector.shape_cast %140 : vector<1x1x4x4xf32> to vector<4x4xf32>
    %cst_83 = arith.constant dense<0.000000e+00> : vector<128x4xf32>
    %142 = tpu.matmul %139, %141, %cst_83 {dimension_numbers = #tpu.dot_dimension_numbers<[1], [0], [0], [1], [0, 0, 1, 1], [], []>} : vector<128x4xf32>, vector<4x4xf32>, vector<128x4xf32> -> vector<128x4xf32>
    %143 = arith.addf %138, %142 : vector<128x4xf32>
    %144 = vector.extract_strided_slice %129 {offsets = [0, 0], sizes = [128, 4], strides = [1, 1]} : vector<160x4xf32> to vector<128x4xf32>
    %c0_84 = arith.constant 0 : index
    %c1_85 = arith.constant 1 : index
    %c0_86 = arith.constant 0 : index
    %c0_87 = arith.constant 0 : index
    %145 = vector.load %arg9[%c0_84, %c1_85, %c0_86, %c0_87] : memref<3x3x4x4xf32, #tpu.memory_space<vmem>>, vector<1x1x4x4xf32>
    %146 = vector.shape_cast %145 : vector<1x1x4x4xf32> to vector<4x4xf32>
    %cst_88 = arith.constant dense<0.000000e+00> : vector<128x4xf32>
    %147 = tpu.matmul %144, %146, %cst_88 {dimension_numbers = #tpu.dot_dimension_numbers<[1], [0], [0], [1], [0, 0, 1, 1], [], []>} : vector<128x4xf32>, vector<4x4xf32>, vector<128x4xf32> -> vector<128x4xf32>
    %148 = arith.addf %143, %147 : vector<128x4xf32>
    %149 = vector.extract_strided_slice %137 {offsets = [0, 0], sizes = [128, 4], strides = [1, 1]} : vector<160x4xf32> to vector<128x4xf32>
    %c0_89 = arith.constant 0 : index
    %c2_90 = arith.constant 2 : index
    %c0_91 = arith.constant 0 : index
    %c0_92 = arith.constant 0 : index
    %150 = vector.load %arg9[%c0_89, %c2_90, %c0_91, %c0_92] : memref<3x3x4x4xf32, #tpu.memory_space<vmem>>, vector<1x1x4x4xf32>
    %151 = vector.shape_cast %150 : vector<1x1x4x4xf32> to vector<4x4xf32>
    %cst_93 = arith.constant dense<0.000000e+00> : vector<128x4xf32>
    %152 = tpu.matmul %149, %151, %cst_93 {dimension_numbers = #tpu.dot_dimension_numbers<[1], [0], [0], [1], [0, 0, 1, 1], [], []>} : vector<128x4xf32>, vector<4x4xf32>, vector<128x4xf32> -> vector<128x4xf32>
    %153 = arith.addf %148, %152 : vector<128x4xf32>
    %154 = vector.extract_strided_slice %128 {offsets = [16, 0], sizes = [128, 4], strides = [1, 1]} : vector<160x4xf32> to vector<128x4xf32>
    %c1_94 = arith.constant 1 : index
    %c0_95 = arith.constant 0 : index
    %c0_96 = arith.constant 0 : index
    %c0_97 = arith.constant 0 : index
    %155 = vector.load %arg9[%c1_94, %c0_95, %c0_96, %c0_97] : memref<3x3x4x4xf32, #tpu.memory_space<vmem>>, vector<1x1x4x4xf32>
    %156 = vector.shape_cast %155 : vector<1x1x4x4xf32> to vector<4x4xf32>
    %cst_98 = arith.constant dense<0.000000e+00> : vector<128x4xf32>
    %157 = tpu.matmul %154, %156, %cst_98 {dimension_numbers = #tpu.dot_dimension_numbers<[1], [0], [0], [1], [0, 0, 1, 1], [], []>} : vector<128x4xf32>, vector<4x4xf32>, vector<128x4xf32> -> vector<128x4xf32>
    %158 = arith.addf %153, %157 : vector<128x4xf32>
    %159 = vector.extract_strided_slice %129 {offsets = [16, 0], sizes = [128, 4], strides = [1, 1]} : vector<160x4xf32> to vector<128x4xf32>
    %c1_99 = arith.constant 1 : index
    %c1_100 = arith.constant 1 : index
    %c0_101 = arith.constant 0 : index
    %c0_102 = arith.constant 0 : index
    %160 = vector.load %arg9[%c1_99, %c1_100, %c0_101, %c0_102] : memref<3x3x4x4xf32, #tpu.memory_space<vmem>>, vector<1x1x4x4xf32>
    %161 = vector.shape_cast %160 : vector<1x1x4x4xf32> to vector<4x4xf32>
    %cst_103 = arith.constant dense<0.000000e+00> : vector<128x4xf32>
    %162 = tpu.matmul %159, %161, %cst_103 {dimension_numbers = #tpu.dot_dimension_numbers<[1], [0], [0], [1], [0, 0, 1, 1], [], []>} : vector<128x4xf32>, vector<4x4xf32>, vector<128x4xf32> -> vector<128x4xf32>
    %163 = arith.addf %158, %162 : vector<128x4xf32>
    %164 = vector.extract_strided_slice %137 {offsets = [16, 0], sizes = [128, 4], strides = [1, 1]} : vector<160x4xf32> to vector<128x4xf32>
    %c1_104 = arith.constant 1 : index
    %c2_105 = arith.constant 2 : index
    %c0_106 = arith.constant 0 : index
    %c0_107 = arith.constant 0 : index
    %165 = vector.load %arg9[%c1_104, %c2_105, %c0_106, %c0_107] : memref<3x3x4x4xf32, #tpu.memory_space<vmem>>, vector<1x1x4x4xf32>
    %166 = vector.shape_cast %165 : vector<1x1x4x4xf32> to vector<4x4xf32>
    %cst_108 = arith.constant dense<0.000000e+00> : vector<128x4xf32>
    %167 = tpu.matmul %164, %166, %cst_108 {dimension_numbers = #tpu.dot_dimension_numbers<[1], [0], [0], [1], [0, 0, 1, 1], [], []>} : vector<128x4xf32>, vector<4x4xf32>, vector<128x4xf32> -> vector<128x4xf32>
    %168 = arith.addf %163, %167 : vector<128x4xf32>
    %169 = vector.extract_strided_slice %128 {offsets = [32, 0], sizes = [128, 4], strides = [1, 1]} : vector<160x4xf32> to vector<128x4xf32>
    %c2_109 = arith.constant 2 : index
    %c0_110 = arith.constant 0 : index
    %c0_111 = arith.constant 0 : index
    %c0_112 = arith.constant 0 : index
    %170 = vector.load %arg9[%c2_109, %c0_110, %c0_111, %c0_112] : memref<3x3x4x4xf32, #tpu.memory_space<vmem>>, vector<1x1x4x4xf32>
    %171 = vector.shape_cast %170 : vector<1x1x4x4xf32> to vector<4x4xf32>
    %cst_113 = arith.constant dense<0.000000e+00> : vector<128x4xf32>
    %172 = tpu.matmul %169, %171, %cst_113 {dimension_numbers = #tpu.dot_dimension_numbers<[1], [0], [0], [1], [0, 0, 1, 1], [], []>} : vector<128x4xf32>, vector<4x4xf32>, vector<128x4xf32> -> vector<128x4xf32>
    %173 = arith.addf %168, %172 : vector<128x4xf32>
    %174 = vector.extract_strided_slice %129 {offsets = [32, 0], sizes = [128, 4], strides = [1, 1]} : vector<160x4xf32> to vector<128x4xf32>
    %c2_114 = arith.constant 2 : index
    %c1_115 = arith.constant 1 : index
    %c0_116 = arith.constant 0 : index
    %c0_117 = arith.constant 0 : index
    %175 = vector.load %arg9[%c2_114, %c1_115, %c0_116, %c0_117] : memref<3x3x4x4xf32, #tpu.memory_space<vmem>>, vector<1x1x4x4xf32>
    %176 = vector.shape_cast %175 : vector<1x1x4x4xf32> to vector<4x4xf32>
    %cst_118 = arith.constant dense<0.000000e+00> : vector<128x4xf32>
    %177 = tpu.matmul %174, %176, %cst_118 {dimension_numbers = #tpu.dot_dimension_numbers<[1], [0], [0], [1], [0, 0, 1, 1], [], []>} : vector<128x4xf32>, vector<4x4xf32>, vector<128x4xf32> -> vector<128x4xf32>
    %178 = arith.addf %173, %177 : vector<128x4xf32>
    %179 = vector.extract_strided_slice %137 {offsets = [32, 0], sizes = [128, 4], strides = [1, 1]} : vector<160x4xf32> to vector<128x4xf32>
    %c2_119 = arith.constant 2 : index
    %c2_120 = arith.constant 2 : index
    %c0_121 = arith.constant 0 : index
    %c0_122 = arith.constant 0 : index
    %180 = vector.load %arg9[%c2_119, %c2_120, %c0_121, %c0_122] : memref<3x3x4x4xf32, #tpu.memory_space<vmem>>, vector<1x1x4x4xf32>
    %181 = vector.shape_cast %180 : vector<1x1x4x4xf32> to vector<4x4xf32>
    %cst_123 = arith.constant dense<0.000000e+00> : vector<128x4xf32>
    %182 = tpu.matmul %179, %181, %cst_123 {dimension_numbers = #tpu.dot_dimension_numbers<[1], [0], [0], [1], [0, 0, 1, 1], [], []>} : vector<128x4xf32>, vector<4x4xf32>, vector<128x4xf32> -> vector<128x4xf32>
    %183 = arith.addf %178, %182 : vector<128x4xf32>
    %c0_124 = arith.constant 0 : index
    %c0_125 = arith.constant 0 : index
    %184 = vector.load %arg10[%c0_124, %c0_125] : memref<1x4xf32, #tpu.memory_space<vmem>>, vector<1x4xf32>
    %185 = vector.broadcast %184 : vector<1x4xf32> to vector<128x4xf32>
    %186 = arith.addf %183, %185 : vector<128x4xf32>
    %187 = vector.shape_cast %186 : vector<128x4xf32> to vector<8x16x4xf32>
    %cst_126 = arith.constant 0.000000e+00 : f32
    %188 = vector.broadcast %cst_126 : f32 to vector<8x16x4xf32>
    %189 = arith.maximumf %187, %188 : vector<8x16x4xf32>
    %c0_127 = arith.constant 0 : index
    %c0_128 = arith.constant 0 : index
    %c0_129 = arith.constant 0 : index
    %c0_130 = arith.constant 0 : index
    %190 = vector.load %arg2[%c0_127, %c0_128, %c0_129, %c0_130] : memref<1x8x16x4xf32, #tpu.memory_space<vmem>>, vector<1x8x16x4xf32>
    %191 = vector.shape_cast %190 : vector<1x8x16x4xf32> to vector<8x16x4xf32>
    %192 = arith.addf %189, %191 : vector<8x16x4xf32>
    %c0_131 = arith.constant 0 : index
    %c0_132 = arith.constant 0 : index
    %c0_133 = arith.constant 0 : index
    %c0_134 = arith.constant 0 : index
    %193 = vector.load %arg11[%c0_131, %c0_132, %c0_133, %c0_134] : memref<1x8x16x4xf32, #tpu.memory_space<vmem>>, vector<1x8x16x4xf32>
    %194 = vector.shape_cast %193 : vector<1x8x16x4xf32> to vector<8x16x4xf32>
    %195 = vector.shape_cast %192 : vector<8x16x4xf32> to vector<1x8x16x4xf32>
    tpu.vector_store %arg11[%c0_131, %c0_132, %c0_133, %c0_134], %195 {strides = array<i32>} : memref<1x8x16x4xf32, #tpu.memory_space<vmem>>, vector<1x8x16x4xf32>,
    return
  }
  func.func @transform_0(%arg0: i32, %arg1: i32) -> (i32, i32, i32, i32) {
    %c0_i32 = arith.constant 0 : i32
    %c0_i32_0 = arith.constant 0 : i32
    %c0_i32_1 = arith.constant 0 : i32
    return %arg0, %arg1, %c0_i32, %c0_i32_0 : i32, i32, i32, i32
  }
  func.func @transform_1(%arg0: i32, %arg1: i32) -> (i32, i32, i32, i32) {
    %c8_i32 = arith.constant 8 : i32
    %0 = arith.muli %arg1, %c8_i32 : i32
    %c2_i32 = arith.constant 2 : i32
    %1 = arith.subi %0, %c2_i32 : i32
    %c0_i32 = arith.constant 0 : i32
    %2 = arith.maxsi %1, %c0_i32 : i32
    %c0_i32_0 = arith.constant 0 : i32
    %c0_i32_1 = arith.constant 0 : i32
    %c0_i32_2 = arith.constant 0 : i32
    return %arg0, %2, %c0_i32_0, %c0_i32_1 : i32, i32, i32, i32
  }
  func.func @transform_2(%arg0: i32, %arg1: i32) -> (i32, i32, i32, i32) {
    %c8_i32 = arith.constant 8 : i32
    %0 = arith.muli %arg1, %c8_i32 : i32
    %c1_i32 = arith.constant 1 : i32
    %1 = arith.subi %0, %c1_i32 : i32
    %c0_i32 = arith.constant 0 : i32
    %2 = arith.maxsi %1, %c0_i32 : i32
    %c0_i32_0 = arith.constant 0 : i32
    %c0_i32_1 = arith.constant 0 : i32
    %c0_i32_2 = arith.constant 0 : i32
    return %arg0, %2, %c0_i32_0, %c0_i32_1 : i32, i32, i32, i32
  }
  func.func @transform_3(%arg0: i32, %arg1: i32) -> (i32, i32, i32, i32) {
    %c8_i32 = arith.constant 8 : i32
    %0 = arith.muli %arg1, %c8_i32 : i32
    %c8_i32_0 = arith.constant 8 : i32
    %1 = arith.addi %0, %c8_i32_0 : i32
    %c15_i32 = arith.constant 15 : i32
    %2 = arith.minsi %1, %c15_i32 : i32
    %c0_i32 = arith.constant 0 : i32
    %c0_i32_1 = arith.constant 0 : i32
    %c0_i32_2 = arith.constant 0 : i32
    return %arg0, %2, %c0_i32, %c0_i32_1 : i32, i32, i32, i32
  }
  func.func @transform_4(%arg0: i32, %arg1: i32) -> (i32, i32, i32, i32) {
    %c8_i32 = arith.constant 8 : i32
    %0 = arith.muli %arg1, %c8_i32 : i32
    %c8_i32_0 = arith.constant 8 : i32
    %1 = arith.addi %0, %c8_i32_0 : i32
    %c1_i32 = arith.constant 1 : i32
    %2 = arith.addi %1, %c1_i32 : i32
    %c15_i32 = arith.constant 15 : i32
    %3 = arith.minsi %2, %c15_i32 : i32
    %c0_i32 = arith.constant 0 : i32
    %c0_i32_1 = arith.constant 0 : i32
    %c0_i32_2 = arith.constant 0 : i32
    return %arg0, %3, %c0_i32, %c0_i32_1 : i32, i32, i32, i32
  }
  func.func @transform_5(%arg0: i32, %arg1: i32) -> (i32, i32, i32, i32) {
    %c0_i32 = arith.constant 0 : i32
    %c0_i32_0 = arith.constant 0 : i32
    %c0_i32_1 = arith.constant 0 : i32
    %c0_i32_2 = arith.constant 0 : i32
    %c0_i32_3 = arith.constant 0 : i32
    return %c0_i32, %c0_i32_0, %c0_i32_1, %c0_i32_2 : i32, i32, i32, i32
  }
  func.func @transform_6(%arg0: i32, %arg1: i32) -> (i32, i32) {
    %c0_i32 = arith.constant 0 : i32
    %c0_i32_0 = arith.constant 0 : i32
    %c0_i32_1 = arith.constant 0 : i32
    return %c0_i32, %c0_i32_0 : i32, i32
  }
  func.func @transform_7(%arg0: i32, %arg1: i32) -> (i32, i32, i32, i32) {
    %c0_i32 = arith.constant 0 : i32
    %c0_i32_0 = arith.constant 0 : i32
    %c0_i32_1 = arith.constant 0 : i32
    %c0_i32_2 = arith.constant 0 : i32
    %c0_i32_3 = arith.constant 0 : i32
    return %c0_i32, %c0_i32_0, %c0_i32_1, %c0_i32_2 : i32, i32, i32, i32
  }
  func.func @transform_8(%arg0: i32, %arg1: i32) -> (i32, i32) {
    %c0_i32 = arith.constant 0 : i32
    %c0_i32_0 = arith.constant 0 : i32
    %c0_i32_1 = arith.constant 0 : i32
    return %c0_i32, %c0_i32_0 : i32, i32
  }
  func.func @transform_9(%arg0: i32, %arg1: i32) -> (i32, i32, i32, i32) {
    %c0_i32 = arith.constant 0 : i32
    %c0_i32_0 = arith.constant 0 : i32
    %c0_i32_1 = arith.constant 0 : i32
    return %arg0, %arg1, %c0_i32, %c0_i32_0 : i32, i32, i32, i32
  }
}

</mosaic_0001>

<bundles_post_ra>
// kernel: tpu_custom_call.1
= control target key start
LH: loop header
LB: loop body
LE: loop exit
PB: predicated region body
PF: predicated region fallthrough
CT: control target
= control target key end

     0   :  { %s6520_s30 = smov 0   ;;  %s6522_s10 = smov 0   ;;  %s8073_s0 = inlined_call_operand.vmem [shape: f32[2,16,16,4], index: 0, kind: input, shape index: {}]   ;;  %s8074_s1 = inlined_call_operand.vmem [shape: f32[2,16,16,4], index: 1, kind: input, shape index: {}]   ;;  %s8075_s2 = inlined_call_operand.vmem [shape: f32[2,16,16,4], index: 2, kind: input, shape index: {}]   ;;  %s8076_s3 = inlined_call_operand.vmem [shape: f32[2,16,16,4], index: 3, kind: input, shape index: {}]   ;;  %s8077_s4 = inlined_call_operand.vmem [shape: f32[2,16,16,4], index: 4, kind: input, shape index: {}]   ;;  %s8078_s5 = inlined_call_operand.vmem [shape: f32[3,3,4,4], index: 5, kind: input, shape index: {}]   ;;  %s8079_s6 = inlined_call_operand.vmem [shape: f32[1,4], index: 6, kind: input, shape index: {}]   ;;  %s8080_s7 = inlined_call_operand.vmem [shape: f32[3,3,4,4], index: 7, kind: input, shape index: {}]   ;;  %s8081_s8 = inlined_call_operand.vmem [shape: f32[1,4], index: 8, kind: input, shape index: {}]   ;;  %s8082_s9 = inlined_call_operand.vmem [shape: f32[2,16,16,4], index: 9, kind: output, shape index: {}]  }
   0x1   :  { %s6524_s11 = smov 0   ;;  %s6526_s12 = smov 0  }
   0x2   :  { %s6528_s13 = smov 0  }
   0x3 LB: > { %8092 = sst [smem:[#allocation2_spill]] %s6459_s11  ;;  %s28_s14 = sadd.s32 1, %s6459_s11  ;;  %s6467_s13 = sphi %s6528_s13, %s19_s13   ;;  %s6463_s12 = sphi %s6526_s12, %s8109_s12   ;;  %s6459_s11 = sphi %s6524_s11, %s8108_s11   ;;  %s6455_s10 = sphi %s6522_s10, %s8107_s10   ;;  %s6451_s30 = sphi %s6520_s30, %s8106_s30  }
   0x4   : > { %8093 = sst [smem:[#allocation3_spill]] %s6463_s12  ;;  %s31_s15 = sadd.s32 1, %s6463_s12 }
   0x5   : > { %8094 = sst [smem:[#allocation4_spill]] %s6467_s13  ;;  %p29_p0 = scmp.ge.s32.totalorder %s28_s14, 2 }
   0x6   : > { %p4806_p1 = scmp.ge.s32.totalorder %s6467_s13, 1  ;;  %p437_p2 = scmp.lt.s32.totalorder %s6467_s13, 5 }
   0x7   : > { %s8111_s14 = smov (%p29_p0, %s28_s14), 0  ;;  %s8113_s15 = smov (!%p29_p0, %s31_s15), %s6463_s12 }
   0x8   : > { %8095 = sst [smem:[#allocation5_spill]] %s8111_s14  ;;  %p438_p3 = pnand %p4806_p1, %p437_p2 }
   0x9   : > { %p33_p4 = scmp.ge.s32.totalorder %s8113_s15, 2 }
   0xa   : > { %441 = sbr.rel (%p438_p3) target bundleno = 1058 (0x422), region = 56 }
   0xb   : > { %s8115_s15 = smov (%p33_p4, %s8113_s15), 0 }
   0xc   : > { %8096 = sst [smem:[#allocation6_spill]] %s8115_s15 }
  0x11   : > { %v4852_v0 = vld [vmem:[%s8078_s5 + $0x4] sm:$0xf]  ;;  %vm901_vm0 = vcmask 1043456   ;;  %s6553_s18 = sshll.u32 %s6451_s30, 3  ;;  %p536_p5 = scmp.lt.s32.totalorder %s6455_s10, 1  ;;  %v676_v2 = vlaneseq  ;;  %vm840_vm1 = vcmask 31744  }
  0x12   : > { %5560 = vmatprep.subr.msk.mxu0 %vm901_vm0, %v4852_v0  ;;  %p538_p6 = scmp.lt.s32.totalorder %s6553_s18, 15  ;;  %v6560_v1 = vld [vmem:[%s8078_s5] sm:$0xf]  ;;  %6082 = vmatprep.subr.msk.mxu1 %vm901_vm0, %v4852_v0  ;;  %s4812_s21 = sadd.s32 4294967294, %s6553_s18  ;;  %v4895_v11 = vld [vmem:[%s8078_s5 + $0x8] sm:$0xf] }
  0x13   : > { %5561 = vmatpush3.msk.msra.mxu0 %vm901_vm0, %v4852_v0  ;;  %6083 = vmatpush3.msk.msra.mxu1 %vm901_vm0, %v4852_v0  ;;  %s8117_s10 = smov (!%p536_p5, %s6455_s10), 1  ;;  %p548_p7 = scmp.gt.s32.totalorder %s4812_s21, 0  ;;  %v6590_v3 = vshrl.u32 %v676_v2, 7  ;;  %v6469_v14 = vmov 0.0   ;;  %v6681_v37 = vld [vmem:[%s8078_s5 + $0xc] sm:$0xf] }
  0x14   : > { %5592 = vmatprep.subr.msk.mxu0 %vm901_vm0, %v6560_v1  ;;  %s539_s22 = scalar_select %p538_p6, %s6553_s18, 15 }
  0x15   : > { %s4822_s23 = sadd.s32 4294967295, %s6553_s18  ;;  %p4813_p8 = scmp.lt.s32.totalorder %s4812_s21, 15  ;;  %vm728_vm2 = vcmp.ne.s32.totalorder %v6590_v3, 0  ;;  %vm703_vm3 = vcmp.lt.s32.totalorder %v6590_v3, 1  ;;  %vm782_vm5 = vcmp.lt.s32.totalorder %v6590_v3, 7 }
  0x16   : > { %p565_p9 = scmp.gt.s32.totalorder %s4822_s23, 0  ;;  %p4823_p10 = scmp.lt.s32.totalorder %s4822_s23, 15  ;;  %v6620_v15 = vsel %vm728_vm2, 1.0, %v6469_v14 }
  0x17   : > { %s8119_s21 = smov (!%p548_p7, %s4812_s21), 0  ;;  %s4808_s24 = sshll.u32 %s539_s22, 1 }
  0x18   : > { %s8121_s23 = smov (!%p565_p9, %s4822_s23), 0  ;;  %s8123_s21 = smov (!%p4813_p8, %s8119_s21), 15 }
  0x19   : > { %s4809_s25 = sshll.u32 %s8117_s10, 5  ;;  %s8125_s23 = smov (!%p4823_p10, %s8121_s23), 15 }
  0x1a   : > { %s4818_s26 = sshll.u32 %s8123_s21, 1  ;;  %s6571_s27 = sadd.s32 8, %s6553_s18 }
  0x1b   : > { %s6573_s28 = sadd.s32 %s4809_s25, %s4808_s24  ;;  %s556_s29 = sadd.s32 %s4818_s26, %s4809_s25 }
  0x1c   : > { %p582_p11 = scmp.lt.s32.totalorder %s6571_s27, 15  ;;  %s4828_s30 = sshll.u32 %s8125_s23, 1 }
  0x1d   : > { %s6577_s16 = sadd.s32 9, %s6553_s18  ;;  %s4820_s10 = sshll.u32 %s556_s29, 3 }
  0x1e   : > { %s583_s17 = scalar_select %p582_p11, %s6571_s27, 15 }
  0x1f   : > { %p599_p12 = scmp.lt.s32.totalorder %s6577_s16, 15  ;;  %s573_s20 = sadd.s32 %s4828_s30, %s4809_s25 }
  0x20   : > { %s8127_s17 = smov (!%p582_p11, %s583_s17), 15  ;;  %p628_p13 = scmp.ge.s32.totalorder %s6553_s18, 2 }
  0x21   : > { %s600_s19 = scalar_select %p599_p12, %s6577_s16, 15 }
  0x22   : > { %s4835_s21 = sshll.u32 %s8127_s17, 1  ;;  %s4810_s24 = sshll.u32 %s6573_s28, 3 }
  0x23   : > { %s6582_s22 = sadd.s32 %s4835_s21, %s4809_s25  ;;  %s558_s23 = scalar_lea.vmem %s8074_s1, %s4820_s10 }
  0x24   : > { %s4830_s14 = sshll.u32 %s573_s20, 3  ;;  %p636_p0 = scmp.ge.s32.totalorder %s6553_s18, 1  ;;  %v626_v4 = vld [vmem:[%s558_s23] sm:$0xff]  ;;  %v627_v5 = vld [vmem:[%s558_s23 + $0x8] sm:$0xff] }
  0x25   : > { %s8129_s19 = smov (!%p599_p12, %s600_s19), 15  ;;  %s6599_s13 = scalar_lea.vmem %s8073_s0, %s4810_s24 }
  0x26   : > { %s629_s29 = scalar_select %p628_p13, 1, 0  ;;  %v6623_v16 = vld [vmem:[%s6599_s13] sm:$0xff]  ;;  %v6626_v17 = vld [vmem:[%s6599_s13 + $0x8] sm:$0xff]  ;;  %v6649_v27 = vld [vmem:[%s6599_s13 + $0x10] sm:$0xff] }
  0x27   : > { %s4842_s12 = sshll.u32 %s8129_s19, 1  ;;  %s575_s20 = scalar_lea.vmem %s8075_s2, %s4830_s14  ;;  %v681_v23 = vrot.slane %v6623_v16, 7  ;;  %v693_v24 = vrot.slane %v6626_v17, 7  ;;  %v6652_v28 = vld [vmem:[%s6599_s13 + $0x18] sm:$0xff]  ;;  %v682_v33 = vrot.slane %v6649_v27, 7  ;;  %v6673_v35 = vld [vmem:[%s6599_s13 + $0x20] sm:$0xff] }
  0x28   : > { %s6592_s30 = sadd.s32 %s4842_s12, %s4809_s25  ;;  %s630_s17 = scvt.s32.f32 %s629_s29  ;;  %v634_v9 = vld [vmem:[%s575_s20] sm:$0xff]  ;;  %v635_v10 = vld [vmem:[%s575_s20 + $0x8] sm:$0xff]  ;;  %v694_v34 = vrot.slane %v6652_v28, 7  ;;  %v683_v41 = vrot.slane %v6673_v35, 7  ;;  %v6705_v43 = vld [vmem:[%s6599_s13 + $0x30] sm:$0xff] }
  0x29   : > { %s637_s12 = scalar_select %p636_p0, 1, 0  ;;  %v718_v32 = vsel %vm703_vm3, %v693_v24, %v681_v23  ;;  %v6676_v36 = vld [vmem:[%s6599_s13 + $0x28] sm:$0xff]  ;;  %v6708_v44 = vld [vmem:[%s6599_s13 + $0x38] sm:$0xff]  ;;  %v6718_v45 = vsel %vm703_vm3, %v681_v23, %v693_v24  ;;  %v684_v48 = vrot.slane %v6705_v43, 7  ;;  %v6730_v50 = vld [vmem:[%s6599_s13 + $0x40] sm:$0xff] }
  0x2a   : > { %v631_v6 = vstv %s630_s17  ;;  %v6694_v39 = vmul.f32 %v6620_v15, %v718_v32  ;;  %v719_v40 = vsel %vm703_vm3, %v694_v34, %v682_v33  ;;  %v695_v42 = vrot.slane %v6676_v36, 7  ;;  %v6733_v51 = vld [vmem:[%s6599_s13 + $0x48] sm:$0xff]  ;;  %v6755_v57 = vld [vmem:[%s6599_s13 + $0x50] sm:$0xff]  ;;  %v6758_v58 = vld [vmem:[%s6599_s13 + $0x58] sm:$0xff]  ;;  %p645_p1 = scmp.lt.s32.totalorder %s6571_s27, 16  ;;  %s4837_s15 = sshll.u32 %s6582_s22, 3 }
  0x2b   : > { %v6607_v7 = vmul.f32 %v631_v6, %v626_v4  ;;  %v6609_v8 = vmul.f32 %v631_v6, %v627_v5  ;;  %s638_s14 = scvt.s32.f32 %s637_s12  ;;  %v6721_v46 = vmul.f32 %v6620_v15, %v719_v40  ;;  %v696_v49 = vrot.slane %v6708_v44, 7  ;;  %v6780_v0 = vld [vmem:[%s6599_s13 + $0x60] sm:$0xff]  ;;  %s592_s11 = scalar_lea.vmem %s8076_s3, %s4837_s15 }
  0x2c   : > { %v720_v47 = vsel %vm703_vm3, %v695_v42, %v683_v41  ;;  %v6743_v52 = vsel %vm703_vm3, %v682_v33, %v694_v34  ;;  %v685_v55 = vrot.slane %v6730_v50, 7  ;;  %v697_v56 = vrot.slane %v6733_v51, 7  ;;  %s646_s21 = scalar_select %p645_p1, 1, 0 }
  0x2d   : > { %v679_v12 = vrot.slane %v6607_v7, 7  ;;  %v691_v13 = vrot.slane %v6609_v8, 7  ;;  %5562 = vmatprep.mubr.msk.f32.mxu0 %vm840_vm1, %v6607_v7  ;;  %v6630_v18 = vstv %s638_s14  ;;  %v6746_v53 = vmul.f32 %v6620_v15, %v720_v47  ;;  %p654_p2 = scmp.lt.s32.totalorder %s6577_s16, 16  ;;  %s4844_s27 = sshll.u32 %s6592_s30, 3 }
  0x2e   : > { %5563 = vmatmul.mubr.msk.f32.vlgmr.msra.gmra.mrb[0].mxu0 %vm840_vm1, %v6609_v8  ;;  %8097 = vst [vmem:[#allocation7_spill] sm:$0xff] %v6630_v18  ;;  %v6637_v20 = vmul.f32 %v6630_v18, %v634_v9  ;;  %v6640_v21 = vmul.f32 %v6630_v18, %v635_v10  ;;  %v721_v54 = vsel %vm703_vm3, %v696_v49, %v684_v48  ;;  %v686_v62 = vrot.slane %v6755_v57, 7  ;;  %v6805_v10 = vld [vmem:[%s6599_s13 + $0x70] sm:$0xff]  ;;  %s647_s10 = scvt.s32.f32 %s646_s21  ;;  %s609_s14 = scalar_lea.vmem %s8077_s4, %s4844_s27 }
  0x2f   : > { %5593 = vmatpush3.msk.msra.mxu0 %vm901_vm0, %v6560_v1  ;;  %v716_v19 = vsel %vm703_vm3, %v691_v13, %v679_v12  ;;  %v704_v29 = vsel %vm703_vm3, %v679_v12, %v691_v13  ;;  %v6768_v59 = vsel %vm703_vm3, %v683_v41, %v695_v42  ;;  %v6771_v60 = vmul.f32 %v6620_v15, %v721_v54  ;;  %v6783_v1 = vld [vmem:[%s6599_s13 + $0x68] sm:$0xff]  ;;  %s655_s22 = scalar_select %p654_p2, 1, 0 }
  0x30   : > { %v734_v22 = vmul.f32 %v6620_v15, %v716_v19  ;;  %5624 = vmatprep.subr.msk.mxu0 %vm901_vm0, %v4895_v11  ;;  %v680_v25 = vrot.slane %v6637_v20, 7  ;;  %v692_v26 = vrot.slane %v6640_v21, 7  ;;  %5565 = vmatprep.mubr.msk.f32.mxu1 %vm840_vm1, %v6637_v20  ;;  %v722_v61 = vsel %vm703_vm3, %v697_v56, %v685_v55  ;;  %s7994_s27 = scalar_lea.vmem %s8082_s9, %s4810_s24 }
  0x31   : > { %5566 = vmatmul.mubr.msk.f32.vlgmr.msra.gmra.mrb[0].mxu1 %vm840_vm1, %v6640_v21  ;;  %v698_v63 = vrot.slane %v6758_v58, 7  ;;  %v6793_v2 = vsel %vm703_vm3, %v684_v48, %v696_v49  ;;  %v6796_v4 = vmul.f32 %v6620_v15, %v722_v61  ;;  %v687_v6 = vrot.slane %v6780_v0, 7  ;;  %s656_s25 = scvt.s32.f32 %s655_s22 }
  0x32   : > { %5594 = vmatprep.mubr.msk.f32.mxu0 %vm840_vm1, %v734_v22  ;;  %v717_v30 = vsel %vm703_vm3, %v692_v26, %v680_v25  ;;  %5568 = vmatprep.mubr.msk.f32.mxu1 %vm840_vm1, %v6623_v16  ;;  %v6691_v38 = vsel %vm703_vm3, %v680_v25, %v692_v26  ;;  %8098 = vst [vmem:[#allocation8_spill] sm:$0xff] %v6793_v2  ;;  %v699_v9 = vrot.slane %v6783_v1, 7  ;;  %v688_v22 = vrot.slane %v6805_v10, 7 }
  0x33   : > { %v6666_v31 = vmul.f32 %v6620_v15, %v717_v30  ;;  %8099 = vst [vmem:[#allocation9_spill] sm:$0xff] %v6796_v4  ;;  %v723_v5 = vsel %vm703_vm3, %v698_v63, %v686_v62  ;;  %v6818_v12 = vsel %vm703_vm3, %v685_v55, %v697_v56  ;;  %v678_v24 = vadd.s32 8, %v6590_v3  ;;  %v6895_v56 = vld [vmem:[%s8078_s5 + $0x10] sm:$0xf] }
  0x34   : > { %v6821_v13 = vmul.f32 %v6620_v15, %v723_v5  ;;  %v724_v19 = vsel %vm703_vm3, %v699_v9, %v687_v6  ;;  %v6838_v25 = vsel %vm703_vm3, %v686_v62, %v698_v63  ;;  %v6855_v30 = vsel %vm703_vm3, %v687_v6, %v699_v9 }
  0x35   : > { %5569 = vmatmul.mubr.msk.f32.gmra.mrb[2].mxu1 %vm840_vm1, %v6626_v17  ;;  %v6841_v26 = vmul.f32 %v6620_v15, %v724_v19  ;;  %vm808_vm4 = vcmp.ne.s32.totalorder %v678_v24, 15  ;;  %v758_v33 = vrot.slane %v6607_v7, 1  ;;  %v770_v34 = vrot.slane %v6609_v8, 1 }
  0x36   : > { %5595 = vmatmul.mubr.msk.f32.vlgmr.msra.gmra.mrb[0].mxu0 %vm840_vm1, %v704_v29  ;;  %5571 = vmatprep.mubr.msk.f32.mxu1 %vm840_vm1, %v6649_v27  ;;  %v6864_v40 = vsel %vm808_vm4, 1.0, %v6469_v14  ;;  %v759_v8 = vrot.slane %v6637_v20, 1  ;;  %v771_v42 = vrot.slane %v6640_v21, 1  ;;  %v760_v49 = vrot.slane %v6623_v16, 1 }
  0x37   : > { %5625 = vmatpush3.msk.msra.mxu0 %vm901_vm0, %v4895_v11  ;;  %5597 = vmatprep.mubr.msk.f32.mxu0 %vm840_vm1, %v6666_v31  ;;  %v6808_v11 = vld [vmem:[%s6599_s13 + $0x78] sm:$0xff]  ;;  %v795_v7 = vsel %vm782_vm5, %v770_v34, %v758_v33  ;;  %v783_v14 = vsel %vm782_vm5, %v758_v33, %v770_v34  ;;  %v772_v54 = vrot.slane %v6626_v17, 1  ;;  %v761_v63 = vrot.slane %v6649_v27, 1 }
  0x38   : > { %5656 = vmatprep.subr.msk.mxu0 %vm901_vm0, %v6681_v37  ;;  %v700_v23 = vrot.slane %v6808_v11, 7  ;;  %v814_v47 = vmul.f32 %v6864_v40, %v795_v7  ;;  %v796_v48 = vsel %vm782_vm5, %v771_v42, %v759_v8  ;;  %v6890_v55 = vsel %vm782_vm5, %v759_v8, %v771_v42 }
  0x39   : > { %5572 = vmatmul.mubr.msk.f32.gmra.mrb[4].mxu1 %vm840_vm1, %v6652_v28  ;;  %v6899_v61 = vmul.f32 %v6864_v40, %v796_v48  ;;  %v797_v62 = vsel %vm782_vm5, %v772_v54, %v760_v49  ;;  %v773_v5 = vrot.slane %v6652_v28, 1  ;;  %v6911_v6 = vsel %vm782_vm5, %v760_v49, %v772_v54 }
  0x3a   : > { %5598 = vmatmul.mubr.msk.f32.gmra.mrb[2].mxu0 %vm840_vm1, %v6691_v38  ;;  %5574 = vmatprep.mubr.msk.f32.mxu1 %vm840_vm1, %v6673_v35  ;;  %v725_v29 = vsel %vm703_vm3, %v700_v23, %v688_v22  ;;  %v6872_v41 = vsel %vm703_vm3, %v688_v22, %v700_v23  ;;  %v762_v19 = vrot.slane %v6673_v35, 1  ;;  %v774_v22 = vrot.slane %v6676_v36, 1 }
  0x3b   : > { %5600 = vmatprep.mubr.msk.f32.mxu0 %vm840_vm1, %v6694_v39  ;;  %v6858_v32 = vmul.f32 %v6620_v15, %v725_v29  ;;  %v798_v9 = vsel %vm782_vm5, %v773_v5, %v761_v63  ;;  %v6928_v23 = vsel %vm782_vm5, %v761_v63, %v773_v5  ;;  %v763_v33 = vrot.slane %v6705_v43, 1 }
  0x3c   : > { %v6933_v24 = vmul.f32 %v6864_v40, %v798_v9  ;;  %v799_v29 = vsel %vm782_vm5, %v774_v22, %v762_v19  ;;  %v775_v34 = vrot.slane %v6708_v44, 1  ;;  %v6943_v7 = vsel %vm782_vm5, %v762_v19, %v774_v22 }
  0x3d   : > { %5575 = vmatmul.mubr.msk.f32.gmra.mrb[6].mxu1 %vm840_vm1, %v6676_v36  ;;  %v6948_v8 = vmul.f32 %v6864_v40, %v799_v29  ;;  %v777_v63 = vrot.slane %v6758_v58, 1  ;;  %v766_v22 = vrot.slane %v6780_v0, 1  ;;  %v778_v29 = vrot.slane %v6783_v1, 1 }
  0x3e   : > { %5601 = vmatmul.mubr.msk.f32.gmra.mrb[4].mxu0 %vm840_vm1, %v6718_v45  ;;  %5577 = vmatprep.mubr.msk.f32.mxu1 %vm840_vm1, %v6705_v43  ;;  %v800_v42 = vsel %vm782_vm5, %v775_v34, %v763_v33  ;;  %v6958_v48 = vsel %vm782_vm5, %v763_v33, %v775_v34  ;;  %v657_v18 = vstv %s656_s25 }
  0x3f   : > { %5603 = vmatprep.mubr.msk.f32.mxu0 %vm840_vm1, %v6721_v46  ;;  %v6963_v49 = vmul.f32 %v6864_v40, %v800_v42  ;;  %v803_v42 = vsel %vm782_vm5, %v778_v29, %v766_v22 }
  0x41   : > { %5578 = vmatmul.mubr.msk.f32.gmra.mrb[8].mxu1 %vm840_vm1, %v6708_v44 }
  0x42   : > { %5604 = vmatmul.mubr.msk.f32.gmra.mrb[6].mxu0 %vm840_vm1, %v6743_v52  ;;  %5580 = vmatprep.mubr.msk.f32.mxu1 %vm840_vm1, %v6730_v50 }
  0x43   : > { %5606 = vmatprep.mubr.msk.f32.mxu0 %vm840_vm1, %v6746_v53 }
  0x45   : > { %5581 = vmatmul.mubr.msk.f32.gmra.mrb[10].mxu1 %vm840_vm1, %v6733_v51 }
  0x46   : > { %5607 = vmatmul.mubr.msk.f32.gmra.mrb[8].mxu0 %vm840_vm1, %v6768_v59  ;;  %5583 = vmatprep.mubr.msk.f32.mxu1 %vm840_vm1, %v6755_v57 }
  0x47   : > { %5609 = vmatprep.mubr.msk.f32.mxu0 %vm840_vm1, %v6771_v60 }
  0x49   : > { %5584 = vmatmul.mubr.msk.f32.gmra.mrb[12].mxu1 %vm840_vm1, %v6758_v58 }
  0x4a   : > { %5610 = vmatmul.mubr.msk.f32.gmra.mrb[10].mxu0 %vm840_vm1, %v6793_v2  ;;  %5586 = vmatprep.mubr.msk.f32.mxu1 %vm840_vm1, %v6780_v0 }
  0x4b   : > { %5612 = vmatprep.mubr.msk.f32.mxu0 %vm840_vm1, %v6796_v4 }
  0x4d   : > { %5587 = vmatmul.mubr.msk.f32.gmra.mrb[14].mxu1 %vm840_vm1, %v6783_v1 }
  0x4e   : > { %5613 = vmatmul.mubr.msk.f32.gmra.mrb[12].mxu0 %vm840_vm1, %v6818_v12  ;;  %5589 = vmatprep.mubr.msk.f32.mxu1 %vm840_vm1, %v6805_v10 }
  0x4f   : > { %5615 = vmatprep.mubr.msk.f32.mxu0 %vm840_vm1, %v6821_v13 }
  0x51   : > { %5590 = vmatmul.mubr.msk.f32.gmra.mrb[16].mxu1 %vm840_vm1, %v6808_v11 }
  0x52   : > { %5616 = vmatmul.mubr.msk.f32.gmra.mrb[14].mxu0 %vm840_vm1, %v6838_v25 }
  0x53   : > { %5618 = vmatprep.mubr.msk.f32.mxu0 %vm840_vm1, %v6841_v26 }
  0x56   : > { %5619 = vmatmul.mubr.msk.f32.gmra.mrb[16].mxu0 %vm840_vm1, %v6855_v30 }
  0x57   : > { %5621 = vmatprep.mubr.msk.f32.mxu0 %vm840_vm1, %v6858_v32 }
  0x5a   : > { %5622 = vmatmul.mubr.msk.f32.gmra.mrb[18].mxu0 %vm840_vm1, %v6872_v41 }
  0x5b   : > { %5626 = vmatprep.mubr.msk.f32.mxu0 %vm840_vm1, %v783_v14  ;;  %v764_v14 = vrot.slane %v6730_v50, 1 }
  0x5e   : > { %5627 = vmatmul.mubr.msk.f32.vlgmr.msra.gmra.mrb[0].mxu0 %vm840_vm1, %v814_v47  ;;  %v776_v47 = vrot.slane %v6733_v51, 1 }
  0x5f   : > { %5657 = vmatpush3.msk.msra.mxu0 %vm901_vm0, %v6681_v37  ;;  %5629 = vmatprep.mubr.msk.f32.mxu0 %vm840_vm1, %v6890_v55  ;;  %v6918_v37 = vmul.f32 %v6864_v40, %v797_v62  ;;  %v765_v62 = vrot.slane %v6755_v57, 1 }
  0x60   : > { %5688 = vmatprep.subr.msk.mxu0 %vm901_vm0, %v6895_v56  ;;  %v801_v54 = vsel %vm782_vm5, %v776_v47, %v764_v14  ;;  %v6973_v5 = vsel %vm782_vm5, %v764_v14, %v776_v47  ;;  %v767_v14 = vrot.slane %v6805_v10, 1  ;;  %v779_v47 = vrot.slane %v6808_v11, 1 }
  0x61   : > { %v6978_v9 = vmul.f32 %v6864_v40, %v801_v54  ;;  %v802_v19 = vsel %vm782_vm5, %v777_v63, %v765_v62  ;;  %v6988_v33 = vsel %vm782_vm5, %v765_v62, %v777_v63  ;;  %v7003_v54 = vsel %vm782_vm5, %v766_v22, %v778_v29  ;;  %v4961_v29 = vld [vmem:[%s8078_s5 + $0x14] sm:$0xf] }
  0x62   : > { %5630 = vmatmul.mubr.msk.f32.gmra.mrb[2].mxu0 %vm840_vm1, %v6899_v61  ;;  %v6993_v34 = vmul.f32 %v6864_v40, %v802_v19  ;;  %v7008_v62 = vmul.f32 %v6864_v40, %v803_v42  ;;  %v804_v63 = vsel %vm782_vm5, %v779_v47, %v767_v14  ;;  %v7016_v19 = vsel %vm782_vm5, %v767_v14, %v779_v47  ;;  %v651_v47 = vld [vmem:[%s609_s14] sm:$0xff] }
  0x63   : > { %5632 = vmatprep.mubr.msk.f32.mxu0 %vm840_vm1, %v6911_v6  ;;  %v7021_v22 = vmul.f32 %v6864_v40, %v804_v63  ;;  %v652_v63 = vld [vmem:[%s609_s14 + $0x8] sm:$0xff] }
  0x66   : > { %5633 = vmatmul.mubr.msk.f32.gmra.mrb[4].mxu0 %vm840_vm1, %v6918_v37 }
  0x67   : > { %5635 = vmatprep.mubr.msk.f32.mxu0 %vm840_vm1, %v6928_v23 }
  0x6a   : > { %5636 = vmatmul.mubr.msk.f32.gmra.mrb[6].mxu0 %vm840_vm1, %v6933_v24 }
  0x6b   : > { %5638 = vmatprep.mubr.msk.f32.mxu0 %vm840_vm1, %v6943_v7 }
  0x6e   : > { %5639 = vmatmul.mubr.msk.f32.gmra.mrb[8].mxu0 %vm840_vm1, %v6948_v8 }
  0x6f   : > { %5641 = vmatprep.mubr.msk.f32.mxu0 %vm840_vm1, %v6958_v48 }
  0x72   : > { %5642 = vmatmul.mubr.msk.f32.gmra.mrb[10].mxu0 %vm840_vm1, %v6963_v49 }
  0x73   : > { %5644 = vmatprep.mubr.msk.f32.mxu0 %vm840_vm1, %v6973_v5 }
  0x76   : > { %5645 = vmatmul.mubr.msk.f32.gmra.mrb[12].mxu0 %vm840_vm1, %v6978_v9 }
  0x77   : > { %5647 = vmatprep.mubr.msk.f32.mxu0 %vm840_vm1, %v6988_v33 }
  0x7a   : > { %5648 = vmatmul.mubr.msk.f32.gmra.mrb[14].mxu0 %vm840_vm1, %v6993_v34 }
  0x7b   : > { %5650 = vmatprep.mubr.msk.f32.mxu0 %vm840_vm1, %v7003_v54 }
  0x7e   : > { %5651 = vmatmul.mubr.msk.f32.gmra.mrb[16].mxu0 %vm840_vm1, %v7008_v62 }
  0x7f   : > { %5653 = vmatprep.mubr.msk.f32.mxu0 %vm840_vm1, %v7016_v19 }
  0x82   : > { %5654 = vmatmul.mubr.msk.f32.gmra.mrb[18].mxu0 %vm840_vm1, %v7021_v22 }
  0x83   : > { %5658 = vmatprep.mubr.msk.f32.mxu0 %vm840_vm1, %v6666_v31  ;;  %v642_v31 = vld [vmem:[%s592_s11] sm:$0xff] }
  0x86   : > { %5659 = vmatmul.mubr.msk.f32.vlgmr.msra.gmra.mrb[0].mxu0 %vm840_vm1, %v6691_v38  ;;  %v643_v38 = vld [vmem:[%s592_s11 + $0x8] sm:$0xff] }
  0x87   : > { %5689 = vmatpush3.msk.msra.mxu0 %vm901_vm0, %v6895_v56  ;;  %5661 = vmatprep.mubr.msk.f32.mxu0 %vm840_vm1, %v6694_v39  ;;  %v7058_v56 = vstv %s647_s10 }
  0x88   : > { %5720 = vmatprep.subr.msk.mxu0 %vm901_vm0, %v4961_v29  ;;  %8100 = vst [vmem:[#allocation10_spill] sm:$0xff] %v7058_v56  ;;  %v7065_v42 = vmul.f32 %v7058_v56, %v642_v31  ;;  %v7068_v14 = vmul.f32 %v7058_v56, %v643_v38 }
  0x8a   : > { %5662 = vmatmul.mubr.msk.f32.gmra.mrb[2].mxu0 %vm840_vm1, %v6718_v45  ;;  %v689_v31 = vrot.slane %v7065_v42, 7  ;;  %v701_v38 = vrot.slane %v7068_v14, 7 }
  0x8b   : > { %5664 = vmatprep.mubr.msk.f32.mxu0 %vm840_vm1, %v6721_v46 }
  0x8c   : > { %v726_v56 = vsel %vm703_vm3, %v701_v38, %v689_v31 }
  0x8e   : > { %5665 = vmatmul.mubr.msk.f32.gmra.mrb[4].mxu0 %vm840_vm1, %v6743_v52 }
  0x8f   : > { %5667 = vmatprep.mubr.msk.f32.mxu0 %vm840_vm1, %v6746_v53 }
  0x92   : > { %5668 = vmatmul.mubr.msk.f32.gmra.mrb[6].mxu0 %vm840_vm1, %v6768_v59 }
  0x93   : > { %5670 = vmatprep.mubr.msk.f32.mxu0 %vm840_vm1, %v6771_v60 }
  0x96   : > { %5671 = vmatmul.mubr.msk.f32.gmra.mrb[8].mxu0 %vm840_vm1, %v6793_v2  ;;  %v7075_v2 = vmul.f32 %v657_v18, %v651_v47  ;;  %v7102_v47 = vsel %vm703_vm3, %v689_v31, %v701_v38  ;;  %v5027_v38 = vld [vmem:[%s8078_s5 + $0x20] sm:$0xf] }
  0x97   : > { %5673 = vmatprep.mubr.msk.f32.mxu0 %vm840_vm1, %v6796_v4  ;;  %v7077_v4 = vmul.f32 %v657_v18, %v652_v63  ;;  %v7094_v18 = vmul.f32 %v6620_v15, %v726_v56  ;;  %v4983_v56 = vld [vmem:[%s8078_s5 + $0x18] sm:$0xf] }
  0x9a   : > { %5674 = vmatmul.mubr.msk.f32.gmra.mrb[10].mxu0 %vm840_vm1, %v6818_v12 }
  0x9b   : > { %5676 = vmatprep.mubr.msk.f32.mxu0 %vm840_vm1, %v6821_v13 }
  0x9e   : > { %5677 = vmatmul.mubr.msk.f32.gmra.mrb[12].mxu0 %vm840_vm1, %v6838_v25 }
  0x9f   : > { %5679 = vmatprep.mubr.msk.f32.mxu0 %vm840_vm1, %v6841_v26 }
  0xa2   : > { %5680 = vmatmul.mubr.msk.f32.gmra.mrb[14].mxu0 %vm840_vm1, %v6855_v30 }
  0xa3   : > { %5682 = vmatprep.mubr.msk.f32.mxu0 %vm840_vm1, %v6858_v32 }
  0xa6   : > { %5683 = vmatmul.mubr.msk.f32.gmra.mrb[16].mxu0 %vm840_vm1, %v6872_v41 }
  0xa7   : > { %5685 = vmatprep.mubr.msk.f32.mxu0 %vm840_vm1, %v7094_v18 }
  0xaa   : > { %5686 = vmatmul.mubr.msk.f32.gmra.mrb[18].mxu0 %vm840_vm1, %v7102_v47 }
  0xab   : > { %5690 = vmatprep.mubr.msk.f32.mxu0 %vm840_vm1, %v6637_v20  ;;  %v5005_v20 = vld [vmem:[%s8078_s5 + $0x1c] sm:$0xf] }
  0xae   : > { %5691 = vmatmul.mubr.msk.f32.vlgmr.msra.gmra.mrb[0].mxu0 %vm840_vm1, %v6640_v21  ;;  %v768_v21 = vrot.slane %v7065_v42, 1 }
  0xaf   : > { %5721 = vmatpush3.msk.msra.mxu0 %vm901_vm0, %v4961_v29  ;;  %5693 = vmatprep.mubr.msk.f32.mxu0 %vm840_vm1, %v6623_v16 }
  0xb0   : > { %5752 = vmatprep.subr.msk.mxu0 %vm901_vm0, %v4983_v56 }
  0xb2   : > { %5694 = vmatmul.mubr.msk.f32.gmra.mrb[2].mxu0 %vm840_vm1, %v6626_v17 }
  0xb3   : > { %5696 = vmatprep.mubr.msk.f32.mxu0 %vm840_vm1, %v6649_v27 }
  0xb6   : > { %5697 = vmatmul.mubr.msk.f32.gmra.mrb[4].mxu0 %vm840_vm1, %v6652_v28 }
  0xb7   : > { %5699 = vmatprep.mubr.msk.f32.mxu0 %vm840_vm1, %v6673_v35 }
  0xba   : > { %5700 = vmatmul.mubr.msk.f32.gmra.mrb[6].mxu0 %vm840_vm1, %v6676_v36 }
  0xbb   : > { %5702 = vmatprep.mubr.msk.f32.mxu0 %vm840_vm1, %v6705_v43 }
  0xbe   : > { %5703 = vmatmul.mubr.msk.f32.gmra.mrb[8].mxu0 %vm840_vm1, %v6708_v44 }
  0xbf   : > { %5705 = vmatprep.mubr.msk.f32.mxu0 %vm840_vm1, %v6730_v50 }
  0xc2   : > { %5706 = vmatmul.mubr.msk.f32.gmra.mrb[10].mxu0 %vm840_vm1, %v6733_v51 }
  0xc3   : > { %5708 = vmatprep.mubr.msk.f32.mxu0 %vm840_vm1, %v6755_v57 }
  0xc6   : > { %5709 = vmatmul.mubr.msk.f32.gmra.mrb[12].mxu0 %vm840_vm1, %v6758_v58 }
  0xc7   : > { %5711 = vmatprep.mubr.msk.f32.mxu0 %vm840_vm1, %v6780_v0 }
  0xca   : > { %5712 = vmatmul.mubr.msk.f32.gmra.mrb[14].mxu0 %vm840_vm1, %v6783_v1 }
  0xcb   : > { %5714 = vmatprep.mubr.msk.f32.mxu0 %vm840_vm1, %v6805_v10 }
  0xce   : > { %5715 = vmatmul.mubr.msk.f32.gmra.mrb[16].mxu0 %vm840_vm1, %v6808_v11 }
  0xcf   : > { %5717 = vmatprep.mubr.msk.f32.mxu0 %vm840_vm1, %v7065_v42 }
  0xd2   : > { %5718 = vmatmul.mubr.msk.f32.gmra.mrb[18].mxu0 %vm840_vm1, %v7068_v14 }
  0xd3   : > { %5722 = vmatprep.mubr.msk.f32.mxu0 %vm840_vm1, %v6890_v55  ;;  %v780_v55 = vrot.slane %v7068_v14, 1 }
  0xd5   : > { %v805_v29 = vsel %vm782_vm5, %v780_v55, %v768_v21  ;;  %v7200_v63 = vsel %vm782_vm5, %v768_v21, %v780_v55 }
  0xd6   : > { %5723 = vmatmul.mubr.msk.f32.vlgmr.msra.gmra.mrb[0].mxu0 %vm840_vm1, %v6899_v61  ;;  %v5050_v61 = vld [vmem:[%s8080_s7 + $0x4] sm:$0xf]  ;;  %v7206_v31 = vmul.f32 %v6864_v40, %v805_v29 }
  0xd7   : > { %5753 = vmatpush3.msk.msra.mxu0 %vm901_vm0, %v4983_v56  ;;  %5725 = vmatprep.mubr.msk.f32.mxu0 %vm840_vm1, %v6911_v6  ;;  %v7389_v56 = vld [vmem:[%s8080_s7 + $0x8] sm:$0xf] }
  0xd8   : > { %5784 = vmatprep.subr.msk.mxu0 %vm901_vm0, %v5005_v20  ;;  %5848 = vmatprep.subr.msk.mxu1 %vm901_vm0, %v5050_v61 }
  0xd9   : > { %5849 = vmatpush3.msk.msra.mxu1 %vm901_vm0, %v5050_v61 }
  0xda   : > { %5726 = vmatmul.mubr.msk.f32.gmra.mrb[2].mxu0 %vm840_vm1, %v6918_v37 }
  0xdb   : > { %5728 = vmatprep.mubr.msk.f32.mxu0 %vm840_vm1, %v6928_v23 }
  0xde   : > { %5729 = vmatmul.mubr.msk.f32.gmra.mrb[4].mxu0 %vm840_vm1, %v6933_v24 }
  0xdf   : > { %5731 = vmatprep.mubr.msk.f32.mxu0 %vm840_vm1, %v6943_v7 }
  0xe2   : > { %5732 = vmatmul.mubr.msk.f32.gmra.mrb[6].mxu0 %vm840_vm1, %v6948_v8 }
  0xe3   : > { %5734 = vmatprep.mubr.msk.f32.mxu0 %vm840_vm1, %v6958_v48 }
  0xe6   : > { %5735 = vmatmul.mubr.msk.f32.gmra.mrb[8].mxu0 %vm840_vm1, %v6963_v49 }
  0xe7   : > { %5737 = vmatprep.mubr.msk.f32.mxu0 %vm840_vm1, %v6973_v5 }
  0xea   : > { %5738 = vmatmul.mubr.msk.f32.gmra.mrb[10].mxu0 %vm840_vm1, %v6978_v9 }
  0xeb   : > { %5740 = vmatprep.mubr.msk.f32.mxu0 %vm840_vm1, %v6988_v33 }
  0xee   : > { %5741 = vmatmul.mubr.msk.f32.gmra.mrb[12].mxu0 %vm840_vm1, %v6993_v34 }
  0xef   : > { %5743 = vmatprep.mubr.msk.f32.mxu0 %vm840_vm1, %v7003_v54 }
  0xf2   : > { %5744 = vmatmul.mubr.msk.f32.gmra.mrb[14].mxu0 %vm840_vm1, %v7008_v62 }
  0xf3   : > { %5746 = vmatprep.mubr.msk.f32.mxu0 %vm840_vm1, %v7016_v19 }
  0xf6   : > { %5747 = vmatmul.mubr.msk.f32.gmra.mrb[16].mxu0 %vm840_vm1, %v7021_v22 }
  0xf7   : > { %5749 = vmatprep.mubr.msk.f32.mxu0 %vm840_vm1, %v7200_v63 }
  0xfa   : > { %5750 = vmatmul.mubr.msk.f32.gmra.mrb[18].mxu0 %vm840_vm1, %v7206_v31 }
  0xfb   : > { %5754 = vmatprep.mubr.msk.f32.mxu0 %vm840_vm1, %v6694_v39  ;;  %v8101_v39 = vld [vmem:[#allocation8_spill] sm:$0xff] }
  0xfe   : > { %5755 = vmatmul.mubr.msk.f32.vlgmr.msra.gmra.mrb[0].mxu0 %vm840_vm1, %v6718_v45  ;;  %v8102_v45 = vld [vmem:[#allocation9_spill] sm:$0xff] }
  0xff   : > { %5785 = vmatpush3.msk.msra.mxu0 %vm901_vm0, %v5005_v20  ;;  %5757 = vmatprep.mubr.msk.f32.mxu0 %vm840_vm1, %v6721_v46  ;;  %v690_v46 = vrot.slane %v7075_v2, 7 }
 0x100   : > { %5816 = vmatprep.subr.msk.mxu0 %vm901_vm0, %v5027_v38 }
 0x102   : > { %5758 = vmatmul.mubr.msk.f32.gmra.mrb[2].mxu0 %vm840_vm1, %v6743_v52  ;;  %v702_v52 = vrot.slane %v7077_v4, 7 }
 0x103   : > { %5760 = vmatprep.mubr.msk.f32.mxu0 %vm840_vm1, %v6746_v53 }
 0x104   : > { %v727_v53 = vsel %vm703_vm3, %v702_v52, %v690_v46 }
 0x106   : > { %5761 = vmatmul.mubr.msk.f32.gmra.mrb[4].mxu0 %vm840_vm1, %v6768_v59  ;;  %v756_v59 = vmul.f32 %v6620_v15, %v727_v53 }
 0x107   : > { %5763 = vmatprep.mubr.msk.f32.mxu0 %vm840_vm1, %v6771_v60  ;;  %v715_v60 = vsel %vm703_vm3, %v690_v46, %v702_v52 }
 0x10a   : > { %5764 = vmatmul.mubr.msk.f32.gmra.mrb[6].mxu0 %vm840_vm1, %v8101_v39 }
 0x10b   : > { %5766 = vmatprep.mubr.msk.f32.mxu0 %vm840_vm1, %v8102_v45 }
 0x10e   : > { %5767 = vmatmul.mubr.msk.f32.gmra.mrb[8].mxu0 %vm840_vm1, %v6818_v12 }
 0x10f   : > { %5769 = vmatprep.mubr.msk.f32.mxu0 %vm840_vm1, %v6821_v13 }
 0x112   : > { %5770 = vmatmul.mubr.msk.f32.gmra.mrb[10].mxu0 %vm840_vm1, %v6838_v25 }
 0x113   : > { %5772 = vmatprep.mubr.msk.f32.mxu0 %vm840_vm1, %v6841_v26 }
 0x116   : > { %5773 = vmatmul.mubr.msk.f32.gmra.mrb[12].mxu0 %vm840_vm1, %v6855_v30 }
 0x117   : > { %5775 = vmatprep.mubr.msk.f32.mxu0 %vm840_vm1, %v6858_v32 }
 0x11a   : > { %5776 = vmatmul.mubr.msk.f32.gmra.mrb[14].mxu0 %vm840_vm1, %v6872_v41  ;;  %v7377_v41 = vld [vmem:[%s8079_s6] ss:$0 sm:$0xff] }
 0x11b   : > { %5778 = vmatprep.mubr.msk.f32.mxu0 %vm840_vm1, %v7094_v18 }
 0x11e   : > { %5779 = vmatmul.mubr.msk.f32.gmra.mrb[16].mxu0 %vm840_vm1, %v7102_v47 }
 0x11f   : > { %5781 = vmatprep.mubr.msk.f32.mxu0 %vm840_vm1, %v756_v59 }
 0x122   : > { %5782 = vmatmul.mubr.msk.f32.gmra.mrb[18].mxu0 %vm840_vm1, %v715_v60 }
 0x123   : > { %5786 = vmatprep.mubr.msk.f32.mxu0 %vm840_vm1, %v6623_v16  ;;  %v769_v16 = vrot.slane %v7075_v2, 1 }
 0x126   : > { %5787 = vmatmul.mubr.msk.f32.vlgmr.msra.gmra.mrb[0].mxu0 %vm840_vm1, %v6626_v17  ;;  %v781_v17 = vrot.slane %v7077_v4, 1 }
 0x127   : > { %5817 = vmatpush3.msk.msra.mxu0 %vm901_vm0, %v5027_v38  ;;  %5789 = vmatprep.mubr.msk.f32.mxu0 %vm840_vm1, %v6649_v27 }
 0x128   : > { %v806_v27 = vsel %vm782_vm5, %v781_v17, %v769_v16 }
 0x12a   : > { %5790 = vmatmul.mubr.msk.f32.gmra.mrb[2].mxu0 %vm840_vm1, %v6652_v28  ;;  %v794_v28 = vsel %vm782_vm5, %v769_v16, %v781_v17 }
 0x12b   : > { %5792 = vmatprep.mubr.msk.f32.mxu0 %vm840_vm1, %v6673_v35  ;;  %v836_v35 = vmul.f32 %v6864_v40, %v806_v27 }
 0x12e   : > { %5793 = vmatmul.mubr.msk.f32.gmra.mrb[4].mxu0 %vm840_vm1, %v6676_v36  ;;  %v5567_v36 = vpop.f32.mrb[0].mxu1 }
 0x12f   : > { %5795 = vmatprep.mubr.msk.f32.mxu0 %vm840_vm1, %v6705_v43  ;;  %v981_v43 = vpop.f32.mrb[1].mxu1 }
 0x132   : > { %5796 = vmatmul.mubr.msk.f32.gmra.mrb[6].mxu0 %vm840_vm1, %v6708_v44  ;;  %v5570_v44 = vpop.f32.mrb[2].mxu1 }
 0x133   : > { %5798 = vmatprep.mubr.msk.f32.mxu0 %vm840_vm1, %v6730_v50  ;;  %v991_v50 = vpop.f32.mrb[3].mxu1 }
 0x136   : > { %5799 = vmatmul.mubr.msk.f32.gmra.mrb[8].mxu0 %vm840_vm1, %v6733_v51  ;;  %v5573_v51 = vpop.f32.mrb[4].mxu1 }
 0x137   : > { %5801 = vmatprep.mubr.msk.f32.mxu0 %vm840_vm1, %v6755_v57  ;;  %v1001_v57 = vpop.f32.mrb[5].mxu1 }
 0x13a   : > { %5802 = vmatmul.mubr.msk.f32.gmra.mrb[10].mxu0 %vm840_vm1, %v6758_v58  ;;  %v2895_v58 = vld [vmem:[%s8080_s7] sm:$0xf] }
 0x13b   : > { %5804 = vmatprep.mubr.msk.f32.mxu0 %vm840_vm1, %v6780_v0  ;;  %5874 = vmatprep.subr.msk.mxu1 %vm901_vm0, %v2895_v58  ;;  %v5576_v0 = vpop.f32.mrb[6].mxu1 }
 0x13e   : > { %5805 = vmatmul.mubr.msk.f32.gmra.mrb[12].mxu0 %vm840_vm1, %v6783_v1  ;;  %v7352_v1 = vpop.f32.mrb[7].mxu1 }
 0x13f   : > { %5807 = vmatprep.mubr.msk.f32.mxu0 %vm840_vm1, %v6805_v10 }
 0x142   : > { %5808 = vmatmul.mubr.msk.f32.gmra.mrb[14].mxu0 %vm840_vm1, %v6808_v11 }
 0x143   : > { %5810 = vmatprep.mubr.msk.f32.mxu0 %vm840_vm1, %v7065_v42 }
 0x146   : > { %5811 = vmatmul.mubr.msk.f32.gmra.mrb[16].mxu0 %vm840_vm1, %v7068_v14 }
 0x147   : > { %5813 = vmatprep.mubr.msk.f32.mxu0 %vm840_vm1, %v7075_v2  ;;  %v7354_v2 = vpop.f32.mrb[8].mxu1 }
 0x14a   : > { %5814 = vmatmul.mubr.msk.f32.gmra.mrb[18].mxu0 %vm840_vm1, %v7077_v4  ;;  %v7356_v4 = vpop.f32.mrb[9].mxu1 }
 0x14b   : > { %5818 = vmatprep.mubr.msk.f32.mxu0 %vm840_vm1, %v6911_v6  ;;  %v7358_v10 = vpop.f32.mrb[10].mxu1 }
 0x14c   : > { %v7360_v11 = vpop.f32.mrb[11].mxu1 }
 0x14d   : > { %v7362_v12 = vpop.f32.mrb[12].mxu1 }
 0x14e   : > { %5819 = vmatmul.mubr.msk.f32.vlgmr.msra.gmra.mrb[0].mxu0 %vm840_vm1, %v6918_v37  ;;  %v7364_v13 = vpop.f32.mrb[13].mxu1 }
 0x14f   : > { %5821 = vmatprep.mubr.msk.f32.mxu0 %vm840_vm1, %v6928_v23  ;;  %v7366_v25 = vpop.f32.mrb[14].mxu1 }
 0x150   : > { %v7368_v26 = vpop.f32.mrb[15].mxu1 }
 0x151   : > { %v7370_v30 = vpop.f32.mrb[16].mxu1 }
 0x152   : > { %5822 = vmatmul.mubr.msk.f32.gmra.mrb[2].mxu0 %vm840_vm1, %v6933_v24  ;;  %v7372_v32 = vpop.f32.mrb[17].mxu1 }
 0x153   : > { %5824 = vmatprep.mubr.msk.f32.mxu0 %vm840_vm1, %v6943_v7 }
 0x156   : > { %5825 = vmatmul.mubr.msk.f32.gmra.mrb[4].mxu0 %vm840_vm1, %v6948_v8 }
 0x157   : > { %5827 = vmatprep.mubr.msk.f32.mxu0 %vm840_vm1, %v6958_v48 }
 0x15a   : > { %5828 = vmatmul.mubr.msk.f32.gmra.mrb[6].mxu0 %vm840_vm1, %v6963_v49  ;;  %v8103_v49 = vld [vmem:[#allocation7_spill] sm:$0xff] }
 0x15b   : > { %5830 = vmatprep.mubr.msk.f32.mxu0 %vm840_vm1, %v6973_v5 }
 0x15e   : > { %5831 = vmatmul.mubr.msk.f32.gmra.mrb[8].mxu0 %vm840_vm1, %v6978_v9 }
 0x15f   : > { %5833 = vmatprep.mubr.msk.f32.mxu0 %vm840_vm1, %v6988_v33 }
 0x162   : > { %5834 = vmatmul.mubr.msk.f32.gmra.mrb[10].mxu0 %vm840_vm1, %v6993_v34 }
 0x163   : > { %5836 = vmatprep.mubr.msk.f32.mxu0 %vm840_vm1, %v7003_v54 }
 0x166   : > { %5837 = vmatmul.mubr.msk.f32.gmra.mrb[12].mxu0 %vm840_vm1, %v7008_v62 }
 0x167   : > { %5839 = vmatprep.mubr.msk.f32.mxu0 %vm840_vm1, %v7016_v19 }
 0x16a   : > { %5840 = vmatmul.mubr.msk.f32.gmra.mrb[14].mxu0 %vm840_vm1, %v7021_v22 }
 0x16b   : > { %5842 = vmatprep.mubr.msk.f32.mxu0 %vm840_vm1, %v7200_v63 }
 0x16e   : > { %5843 = vmatmul.mubr.msk.f32.gmra.mrb[16].mxu0 %vm840_vm1, %v7206_v31 }
 0x16f   : > { %5845 = vmatprep.mubr.msk.f32.mxu0 %vm840_vm1, %v794_v28 }
 0x172   : > { %5846 = vmatmul.mubr.msk.f32.gmra.mrb[18].mxu0 %vm840_vm1, %v836_v35 }
 0x221   : > { %v5820_v6 = vpop.f32.mrb[0].mxu0 }
 0x222   : > { %v2732_v37 = vadd.f32 %v5820_v6, %v7377_v41  ;;  %v2605_v23 = vpop.f32.mrb[1].mxu0 }
 0x223   : > { %v2731_v24 = vadd.f32 %v7377_v41, %v2605_v23 }
 0x224   : > { %v2752_v7 = vmax.f32 %v2732_v37, 0.0 }
 0x225   : > { %v2751_v8 = vmax.f32 %v2731_v24, 0.0  ;;  %v5823_v48 = vpop.f32.mrb[2].mxu0 }
 0x226   : > { %v2772_v5 = vmul.f32 %v2752_v7, %v8103_v49  ;;  %v6084_v9 = vadd.f32 %v5823_v48, %v5567_v36  ;;  %v2615_v33 = vpop.f32.mrb[3].mxu0 }
 0x227   : > { %v2771_v34 = vmul.f32 %v2751_v8, %v8103_v49  ;;  %v6085_v54 = vadd.f32 %v2615_v33, %v981_v43 }
 0x228   : > { %v2785_v62 = vrot.slane %v2772_v5, 7  ;;  %v2845_v19 = vrot.slane %v2772_v5, 1  ;;  %v2734_v22 = vadd.f32 %v6084_v9, %v7377_v41 }
 0x229   : > { %v2775_v42 = vrot.slane %v2771_v34, 7  ;;  %v2835_v14 = vrot.slane %v2771_v34, 1  ;;  %v2733_v18 = vadd.f32 %v6085_v54, %v7377_v41  ;;  %v5826_v47 = vpop.f32.mrb[4].mxu0  ;;  %5850 = vmatprep.mubr.msk.f32.mxu1 %vm840_vm1, %v2771_v34 }
 0x22a   : > { %v6086_v20 = vadd.f32 %v5826_v47, %v5570_v44  ;;  %v2625_v21 = vpop.f32.mrb[5].mxu0  ;;  %5851 = vmatmul.mubr.msk.f32.vlgmr.msra.gmra.mrb[18].mxu1 %vm840_vm1, %v2772_v5  ;;  %v7403_v31 = vmax.f32 %v2734_v22, 0.0 }
 0x22b   : > { %v7394_v55 = vsel %vm782_vm5, %v2845_v19, %v2835_v14  ;;  %v7396_v61 = vmax.f32 %v2733_v18, 0.0  ;;  %v6087_v29 = vadd.f32 %v2625_v21, %v991_v50  ;;  %5875 = vmatpush3.msk.msra.mxu1 %vm901_vm0, %v2895_v58  ;;  %v7401_v63 = vsel %vm703_vm3, %v2785_v62, %v2775_v42 }
 0x22c   : > { %v2736_v38 = vadd.f32 %v6086_v20, %v7377_v41  ;;  %5900 = vmatprep.subr.msk.mxu1 %vm901_vm0, %v7389_v56  ;;  %v7413_v46 = vsel %vm703_vm3, %v2775_v42, %v2785_v62  ;;  %v7417_v52 = vsel %vm782_vm5, %v2835_v14, %v2845_v19 }
 0x22d   : > { %v2735_v39 = vadd.f32 %v6087_v29, %v7377_v41  ;;  %v5829_v45 = vpop.f32.mrb[6].mxu0  ;;  %5853 = vmatprep.mubr.msk.f32.mxu1 %vm840_vm1, %v7396_v61  ;;  %v2776_v47 = vrot.slane %v7396_v61, 7 }
 0x22e   : > { %v6088_v53 = vadd.f32 %v5829_v45, %v5573_v51  ;;  %v2635_v59 = vpop.f32.mrb[7].mxu0  ;;  %5854 = vmatmul.mubr.msk.f32.gmra.mrb[20].mxu1 %vm840_vm1, %v7403_v31  ;;  %v7423_v17 = vmax.f32 %v2736_v38, 0.0 }
 0x22f   : > { %v7421_v60 = vmax.f32 %v2735_v39, 0.0  ;;  %v6089_v16 = vadd.f32 %v2635_v59, %v1001_v57 }
 0x230   : > { %v2738_v27 = vadd.f32 %v6088_v53, %v7377_v41 }
 0x231   : > { %v2737_v28 = vadd.f32 %v6089_v16, %v7377_v41  ;;  %v5832_v35 = vpop.f32.mrb[8].mxu0  ;;  %5856 = vmatprep.mubr.msk.f32.mxu1 %vm840_vm1, %v7421_v60 }
 0x232   : > { %v6090_v36 = vadd.f32 %v5832_v35, %v5576_v0  ;;  %v2645_v43 = vpop.f32.mrb[9].mxu0  ;;  %5857 = vmatmul.mubr.msk.f32.gmra.mrb[22].mxu1 %vm840_vm1, %v7423_v17  ;;  %v7434_v51 = vmax.f32 %v2738_v27, 0.0  ;;  %v2777_v27 = vrot.slane %v7421_v60, 7 }
 0x233   : > { %v7431_v44 = vmax.f32 %v2737_v28, 0.0  ;;  %v6091_v50 = vadd.f32 %v2645_v43, %v7352_v1  ;;  %v2787_v28 = vrot.slane %v7423_v17, 7  ;;  %v5103_v43 = vld [vmem:[%s8080_s7 + $0xc] sm:$0xf] }
 0x234   : > { %v2740_v57 = vadd.f32 %v6090_v36, %v7377_v41 }
 0x235   : > { %v2739_v58 = vadd.f32 %v6091_v50, %v7377_v41  ;;  %v5835_v6 = vpop.f32.mrb[10].mxu0  ;;  %5859 = vmatprep.mubr.msk.f32.mxu1 %vm840_vm1, %v7431_v44  ;;  %v2778_v50 = vrot.slane %v7431_v44, 7 }
 0x236   : > { %v6092_v0 = vadd.f32 %v5835_v6, %v7354_v2  ;;  %v2655_v37 = vpop.f32.mrb[11].mxu0  ;;  %5860 = vmatmul.mubr.msk.f32.gmra.mrb[24].mxu1 %vm840_vm1, %v7434_v51  ;;  %v7446_v24 = vmax.f32 %v2740_v57, 0.0  ;;  %v2788_v57 = vrot.slane %v7434_v51, 7 }
 0x237   : > { %v7443_v23 = vmax.f32 %v2739_v58, 0.0  ;;  %v6093_v1 = vadd.f32 %v2655_v37, %v7356_v4 }
 0x238   : > { %v2742_v7 = vadd.f32 %v6092_v0, %v7377_v41  ;;  %v2808_v58 = vsel %vm703_vm3, %v2788_v57, %v2778_v50  ;;  %v2789_v6 = vrot.slane %v7446_v24, 7  ;;  %v7545_v0 = vsel %vm703_vm3, %v2777_v27, %v2787_v28 }
 0x239   : > { %v2741_v8 = vadd.f32 %v6093_v1, %v7377_v41  ;;  %v5838_v48 = vpop.f32.mrb[12].mxu0  ;;  %5862 = vmatprep.mubr.msk.f32.mxu1 %vm840_vm1, %v7443_v23  ;;  %v7548_v37 = vmul.f32 %v6620_v15, %v2808_v58  ;;  %v2849_v58 = vrot.slane %v7446_v24, 1 }
 0x23a   : > { %v6094_v2 = vadd.f32 %v5838_v48, %v7358_v10  ;;  %v2665_v49 = vpop.f32.mrb[13].mxu0  ;;  %5863 = vmatmul.mubr.msk.f32.gmra.mrb[26].mxu1 %vm840_vm1, %v7446_v24  ;;  %v7458_v9 = vmax.f32 %v2742_v7, 0.0  ;;  %v7560_v48 = vsel %vm703_vm3, %v2778_v50, %v2788_v57  ;;  %v2839_v57 = vrot.slane %v7443_v23, 1 }
 0x23b   : > { %v7455_v5 = vmax.f32 %v2741_v8, 0.0  ;;  %v6095_v4 = vadd.f32 %v2665_v49, %v7360_v11 }
 0x23c   : > { %v2744_v33 = vadd.f32 %v6094_v2, %v7377_v41  ;;  %v2790_v8 = vrot.slane %v7458_v9, 7 }
 0x23d   : > { %v2743_v34 = vadd.f32 %v6095_v4, %v7377_v41  ;;  %v5841_v54 = vpop.f32.mrb[14].mxu0  ;;  %5865 = vmatprep.mubr.msk.f32.mxu1 %vm840_vm1, %v7455_v5  ;;  %v2780_v7 = vrot.slane %v7455_v5, 7 }
 0x23e   : > { %v6096_v10 = vadd.f32 %v5841_v54, %v7362_v12  ;;  %v2675_v62 = vpop.f32.mrb[15].mxu0  ;;  %5866 = vmatmul.mubr.msk.f32.gmra.mrb[28].mxu1 %vm840_vm1, %v7458_v9  ;;  %v7470_v22 = vmax.f32 %v2744_v33, 0.0  ;;  %v2786_v12 = vrot.slane %v7403_v31, 7 }
 0x23f   : > { %v7467_v19 = vmax.f32 %v2743_v34, 0.0  ;;  %v6097_v11 = vadd.f32 %v2675_v62, %v7364_v13  ;;  %v2810_v49 = vsel %vm703_vm3, %v2790_v8, %v2780_v7 }
 0x240   : > { %v2746_v42 = vadd.f32 %v6096_v10, %v7377_v41  ;;  %v2791_v33 = vrot.slane %v7470_v22, 7  ;;  %v7578_v54 = vmul.f32 %v6620_v15, %v2810_v49  ;;  %v7681_v49 = vsel %vm782_vm5, %v2839_v57, %v2849_v58 }
 0x241   : > { %v2745_v14 = vadd.f32 %v6097_v11, %v7377_v41  ;;  %v5844_v18 = vpop.f32.mrb[16].mxu0  ;;  %5868 = vmatprep.mubr.msk.f32.mxu1 %vm840_vm1, %v7467_v19  ;;  %v2781_v4 = vrot.slane %v7467_v19, 7 }
 0x242   : > { %v6098_v20 = vadd.f32 %v5844_v18, %v7366_v25  ;;  %v2685_v21 = vpop.f32.mrb[17].mxu0  ;;  %5869 = vmatmul.mubr.msk.f32.gmra.mrb[30].mxu1 %vm840_vm1, %v7470_v22  ;;  %v7484_v38 = vmax.f32 %v2746_v42, 0.0  ;;  %v2815_v25 = vmul.f32 %v6620_v15, %v7401_v63  ;;  %v7590_v42 = vsel %vm703_vm3, %v2780_v7, %v2790_v8 }
 0x243   : > { %v7481_v13 = vmax.f32 %v2745_v14, 0.0  ;;  %v6099_v29 = vadd.f32 %v2685_v21, %v7368_v26  ;;  %v2806_v26 = vsel %vm703_vm3, %v2786_v12, %v2776_v47  ;;  %v2811_v10 = vsel %vm703_vm3, %v2791_v33, %v2781_v4 }
 0x244   : > { %v7487_v39 = vadd.f32 %v6098_v20, %v7377_v41  ;;  %v7512_v63 = vmul.f32 %v6620_v15, %v2806_v26  ;;  %v2792_v11 = vrot.slane %v7484_v38, 7  ;;  %v7593_v14 = vmul.f32 %v6620_v15, %v2811_v10  ;;  %v5121_v26 = vld [vmem:[%s8080_s7 + $0x10] sm:$0xf] }
 0x245   : > { %v7490_v45 = vadd.f32 %v6099_v29, %v7377_v41  ;;  %v5847_v53 = vpop.f32.mrb[18].mxu0  ;;  %5871 = vmatprep.mubr.msk.f32.mxu1 %vm840_vm1, %v7481_v13  ;;  %v2782_v62 = vrot.slane %v7481_v13, 7  ;;  %v2836_v21 = vrot.slane %v7396_v61, 1  ;;  %v2846_v29 = vrot.slane %v7403_v31, 1 }
 0x246   : > { %v6100_v59 = vadd.f32 %v5847_v53, %v7370_v30  ;;  %v2695_v16 = vpop.f32.mrb[19].mxu0  ;;  %5872 = vmatmul.mubr.msk.f32.gmra.mrb[32].mxu1 %vm840_vm1, %v7484_v38  ;;  %v2876_v53 = vmul.f32 %v6864_v40, %v7394_v55  ;;  %v2840_v7 = vrot.slane %v7455_v5, 1  ;;  %v2850_v8 = vrot.slane %v7458_v9, 1 }
 0x247   : > { %v6101_v35 = vadd.f32 %v2695_v16, %v7372_v32  ;;  %5876 = vmatprep.mubr.msk.f32.mxu1 %vm840_vm1, %v2815_v25  ;;  %v2807_v32 = vsel %vm703_vm3, %v2787_v28, %v2777_v27  ;;  %v2812_v18 = vsel %vm703_vm3, %v2792_v11, %v2782_v62  ;;  %v7614_v20 = vsel %vm703_vm3, %v2782_v62, %v2792_v11 }
 0x248   : > { %v7506_v36 = vadd.f32 %v6100_v59, %v7377_v41  ;;  %v2866_v25 = vsel %vm782_vm5, %v2846_v29, %v2836_v21  ;;  %v2837_v59 = vrot.slane %v7421_v60, 1  ;;  %v2847_v16 = vrot.slane %v7423_v17, 1 }
 0x249   : > { %v7509_v30 = vadd.f32 %v6101_v35, %v7377_v41  ;;  %v7530_v41 = vsel %vm703_vm3, %v2776_v47, %v2786_v12  ;;  %v7603_v12 = vsel %vm703_vm3, %v2781_v4, %v2791_v33  ;;  %v7606_v47 = vmul.f32 %v6620_v15, %v2812_v18 }
 0x24a   : > { %5877 = vmatmul.mubr.msk.f32.vlgmr.msra.gmra.mrb[18].mxu1 %vm840_vm1, %v7413_v46  ;;  %v7533_v46 = vmul.f32 %v6620_v15, %v2807_v32  ;;  %v7634_v27 = vsel %vm782_vm5, %v2836_v21, %v2846_v29  ;;  %v7640_v55 = vmul.f32 %v6864_v40, %v2866_v25  ;;  %v2838_v28 = vrot.slane %v7431_v44, 1 }
 0x24b   : > { %5901 = vmatpush3.msk.msra.mxu1 %vm901_vm0, %v7389_v56  ;;  %5879 = vmatprep.mubr.msk.f32.mxu1 %vm840_vm1, %v7512_v63  ;;  %v2779_v56 = vrot.slane %v7443_v23, 7  ;;  %v2848_v35 = vrot.slane %v7434_v51, 1  ;;  %v2870_v33 = vsel %vm782_vm5, %v2850_v8, %v2840_v7  ;;  %v2841_v10 = vrot.slane %v7467_v19, 1 }
 0x24c   : > { %5926 = vmatprep.subr.msk.mxu1 %vm901_vm0, %v5103_v43  ;;  %v2851_v62 = vrot.slane %v7470_v22, 1  ;;  %v7696_v11 = vsel %vm782_vm5, %v2840_v7, %v2850_v8  ;;  %v7701_v18 = vmul.f32 %v6864_v40, %v2870_v33  ;;  %v2842_v29 = vrot.slane %v7481_v13, 1  ;;  %v5193_v8 = vld [vmem:[%s8080_s7 + $0x20] sm:$0xf] }
 0x24d   : > { %v2809_v1 = vsel %vm703_vm3, %v2789_v6, %v2779_v56  ;;  %v7575_v34 = vsel %vm703_vm3, %v2779_v56, %v2789_v6  ;;  %v2868_v50 = vsel %vm782_vm5, %v2848_v35, %v2838_v28  ;;  %v7666_v56 = vsel %vm782_vm5, %v2838_v28, %v2848_v35  ;;  %v5139_v35 = vld [vmem:[%s8080_s7 + $0x14] sm:$0xf] }
 0x24e   : > { %5880 = vmatmul.mubr.msk.f32.gmra.mrb[20].mxu1 %vm840_vm1, %v7530_v41  ;;  %v7563_v2 = vmul.f32 %v6620_v15, %v2809_v1  ;;  %v7671_v6 = vmul.f32 %v6864_v40, %v2868_v50  ;;  %v2869_v1 = vsel %vm782_vm5, %v2849_v58, %v2839_v57  ;;  %v2871_v21 = vsel %vm782_vm5, %v2851_v62, %v2841_v10  ;;  %v5157_v58 = vld [vmem:[%s8080_s7 + $0x18] sm:$0xf] }
 0x24f   : > { %5882 = vmatprep.mubr.msk.f32.mxu1 %vm840_vm1, %v7533_v46  ;;  %v7686_v4 = vmul.f32 %v6864_v40, %v2869_v1  ;;  %v7711_v25 = vsel %vm782_vm5, %v2841_v10, %v2851_v62  ;;  %v2769_v33 = vmax.f32 %v7509_v30, 0.0  ;;  %v6416_v62 = vld [vmem:[%s6599_s13 + $0x10] sm:$0xff] }
 0x252   : > { %5883 = vmatmul.mubr.msk.f32.gmra.mrb[22].mxu1 %vm840_vm1, %v7545_v0 }
 0x253   : > { %5885 = vmatprep.mubr.msk.f32.mxu1 %vm840_vm1, %v7548_v37 }
 0x256   : > { %5886 = vmatmul.mubr.msk.f32.gmra.mrb[24].mxu1 %vm840_vm1, %v7560_v48 }
 0x257   : > { %5888 = vmatprep.mubr.msk.f32.mxu1 %vm840_vm1, %v7563_v2 }
 0x25a   : > { %5889 = vmatmul.mubr.msk.f32.gmra.mrb[26].mxu1 %vm840_vm1, %v7575_v34 }
 0x25b   : > { %5891 = vmatprep.mubr.msk.f32.mxu1 %vm840_vm1, %v7578_v54 }
 0x25e   : > { %5892 = vmatmul.mubr.msk.f32.gmra.mrb[28].mxu1 %vm840_vm1, %v7590_v42 }
 0x25f   : > { %5894 = vmatprep.mubr.msk.f32.mxu1 %vm840_vm1, %v7593_v14 }
 0x262   : > { %5895 = vmatmul.mubr.msk.f32.gmra.mrb[30].mxu1 %vm840_vm1, %v7603_v12 }
 0x263   : > { %5897 = vmatprep.mubr.msk.f32.mxu1 %vm840_vm1, %v7606_v47 }
 0x266   : > { %5898 = vmatmul.mubr.msk.f32.gmra.mrb[32].mxu1 %vm840_vm1, %v7614_v20 }
 0x267   : > { %5902 = vmatprep.mubr.msk.f32.mxu1 %vm840_vm1, %v7417_v52  ;;  %v2867_v52 = vsel %vm782_vm5, %v2847_v16, %v2837_v59 }
 0x268   : > { %v7656_v32 = vmul.f32 %v6864_v40, %v2867_v52 }
 0x26a   : > { %5903 = vmatmul.mubr.msk.f32.vlgmr.msra.gmra.mrb[18].mxu1 %vm840_vm1, %v2876_v53  ;;  %v2852_v53 = vrot.slane %v7484_v38, 1 }
 0x26b   : > { %5927 = vmatpush3.msk.msra.mxu1 %vm901_vm0, %v5103_v43  ;;  %5905 = vmatprep.mubr.msk.f32.mxu1 %vm840_vm1, %v7634_v27  ;;  %v7651_v43 = vsel %vm782_vm5, %v2837_v59, %v2847_v16  ;;  %v7716_v59 = vmul.f32 %v6864_v40, %v2871_v21 }
 0x26c   : > { %5952 = vmatprep.subr.msk.mxu1 %vm901_vm0, %v5121_v26  ;;  %v2872_v16 = vsel %vm782_vm5, %v2852_v53, %v2842_v29  ;;  %v7724_v52 = vsel %vm782_vm5, %v2842_v29, %v2852_v53 }
 0x26d   : > { %v7729_v28 = vmul.f32 %v6864_v40, %v2872_v16 }
 0x26e   : > { %5906 = vmatmul.mubr.msk.f32.gmra.mrb[20].mxu1 %vm840_vm1, %v7640_v55 }
 0x26f   : > { %5908 = vmatprep.mubr.msk.f32.mxu1 %vm840_vm1, %v7651_v43 }
 0x272   : > { %5909 = vmatmul.mubr.msk.f32.gmra.mrb[22].mxu1 %vm840_vm1, %v7656_v32 }
 0x273   : > { %5911 = vmatprep.mubr.msk.f32.mxu1 %vm840_vm1, %v7666_v56 }
 0x276   : > { %5912 = vmatmul.mubr.msk.f32.gmra.mrb[24].mxu1 %vm840_vm1, %v7671_v6 }
 0x277   : > { %5914 = vmatprep.mubr.msk.f32.mxu1 %vm840_vm1, %v7681_v49 }
 0x27a   : > { %5915 = vmatmul.mubr.msk.f32.gmra.mrb[26].mxu1 %vm840_vm1, %v7686_v4 }
 0x27b   : > { %5917 = vmatprep.mubr.msk.f32.mxu1 %vm840_vm1, %v7696_v11 }
 0x27e   : > { %5918 = vmatmul.mubr.msk.f32.gmra.mrb[28].mxu1 %vm840_vm1, %v7701_v18 }
 0x27f   : > { %5920 = vmatprep.mubr.msk.f32.mxu1 %vm840_vm1, %v7711_v25 }
 0x282   : > { %5921 = vmatmul.mubr.msk.f32.gmra.mrb[30].mxu1 %vm840_vm1, %v7716_v59 }
 0x283   : > { %5923 = vmatprep.mubr.msk.f32.mxu1 %vm840_vm1, %v7724_v52 }
 0x286   : > { %5924 = vmatmul.mubr.msk.f32.gmra.mrb[32].mxu1 %vm840_vm1, %v7729_v28 }
 0x287   : > { %5928 = vmatprep.mubr.msk.f32.mxu1 %vm840_vm1, %v7512_v63  ;;  %v7753_v63 = vmax.f32 %v7487_v39, 0.0 }
 0x28a   : > { %5929 = vmatmul.mubr.msk.f32.vlgmr.msra.gmra.mrb[18].mxu1 %vm840_vm1, %v7530_v41  ;;  %v7756_v41 = vmax.f32 %v7490_v45, 0.0 }
 0x28b   : > { %5953 = vmatpush3.msk.msra.mxu1 %vm901_vm0, %v5121_v26  ;;  %5931 = vmatprep.mubr.msk.f32.mxu1 %vm840_vm1, %v7533_v46  ;;  %v2793_v26 = vrot.slane %v7753_v63, 7 }
 0x28c   : > { %5978 = vmatprep.subr.msk.mxu1 %vm901_vm0, %v5139_v35  ;;  %v2783_v50 = vrot.slane %v7756_v41, 7 }
 0x28e   : > { %5932 = vmatmul.mubr.msk.f32.gmra.mrb[20].mxu1 %vm840_vm1, %v7545_v0  ;;  %v2813_v39 = vsel %vm703_vm3, %v2793_v26, %v2783_v50  ;;  %v7783_v57 = vsel %vm703_vm3, %v2783_v50, %v2793_v26 }
 0x28f   : > { %5934 = vmatprep.mubr.msk.f32.mxu1 %vm840_vm1, %v7548_v37  ;;  %v7775_v45 = vmul.f32 %v6620_v15, %v2813_v39  ;;  %v6419_v39 = vld [vmem:[%s6599_s13 + $0x38] sm:$0xff] }
 0x292   : > { %5935 = vmatmul.mubr.msk.f32.gmra.mrb[22].mxu1 %vm840_vm1, %v7560_v48 }
 0x293   : > { %5937 = vmatprep.mubr.msk.f32.mxu1 %vm840_vm1, %v7563_v2 }
 0x296   : > { %5938 = vmatmul.mubr.msk.f32.gmra.mrb[24].mxu1 %vm840_vm1, %v7575_v34 }
 0x297   : > { %5940 = vmatprep.mubr.msk.f32.mxu1 %vm840_vm1, %v7578_v54 }
 0x29a   : > { %5941 = vmatmul.mubr.msk.f32.gmra.mrb[26].mxu1 %vm840_vm1, %v7590_v42 }
 0x29b   : > { %5943 = vmatprep.mubr.msk.f32.mxu1 %vm840_vm1, %v7593_v14 }
 0x29e   : > { %5944 = vmatmul.mubr.msk.f32.gmra.mrb[28].mxu1 %vm840_vm1, %v7603_v12 }
 0x29f   : > { %5946 = vmatprep.mubr.msk.f32.mxu1 %vm840_vm1, %v7606_v47 }
 0x2a2   : > { %5947 = vmatmul.mubr.msk.f32.gmra.mrb[30].mxu1 %vm840_vm1, %v7614_v20 }
 0x2a3   : > { %5949 = vmatprep.mubr.msk.f32.mxu1 %vm840_vm1, %v7775_v45 }
 0x2a6   : > { %5950 = vmatmul.mubr.msk.f32.gmra.mrb[32].mxu1 %vm840_vm1, %v7783_v57 }
 0x2a7   : > { %5954 = vmatprep.mubr.msk.f32.mxu1 %vm840_vm1, %v7396_v61  ;;  %v5175_v61 = vld [vmem:[%s8080_s7 + $0x1c] sm:$0xf] }
 0x2aa   : > { %5955 = vmatmul.mubr.msk.f32.vlgmr.msra.gmra.mrb[18].mxu1 %vm840_vm1, %v7403_v31  ;;  %v2843_v31 = vrot.slane %v7756_v41, 1 }
 0x2ab   : > { %5979 = vmatpush3.msk.msra.mxu1 %vm901_vm0, %v5139_v35  ;;  %5957 = vmatprep.mubr.msk.f32.mxu1 %vm840_vm1, %v7421_v60 }
 0x2ac   : > { %6004 = vmatprep.subr.msk.mxu1 %vm901_vm0, %v5157_v58 }
 0x2ae   : > { %5958 = vmatmul.mubr.msk.f32.gmra.mrb[20].mxu1 %vm840_vm1, %v7423_v17 }
 0x2af   : > { %5960 = vmatprep.mubr.msk.f32.mxu1 %vm840_vm1, %v7431_v44 }
 0x2b2   : > { %5961 = vmatmul.mubr.msk.f32.gmra.mrb[22].mxu1 %vm840_vm1, %v7434_v51 }
 0x2b3   : > { %5963 = vmatprep.mubr.msk.f32.mxu1 %vm840_vm1, %v7443_v23 }
 0x2b6   : > { %5964 = vmatmul.mubr.msk.f32.gmra.mrb[24].mxu1 %vm840_vm1, %v7446_v24 }
 0x2b7   : > { %5966 = vmatprep.mubr.msk.f32.mxu1 %vm840_vm1, %v7455_v5 }
 0x2ba   : > { %5967 = vmatmul.mubr.msk.f32.gmra.mrb[26].mxu1 %vm840_vm1, %v7458_v9 }
 0x2bb   : > { %5969 = vmatprep.mubr.msk.f32.mxu1 %vm840_vm1, %v7467_v19 }
 0x2be   : > { %5970 = vmatmul.mubr.msk.f32.gmra.mrb[28].mxu1 %vm840_vm1, %v7470_v22 }
 0x2bf   : > { %5972 = vmatprep.mubr.msk.f32.mxu1 %vm840_vm1, %v7481_v13 }
 0x2c2   : > { %5973 = vmatmul.mubr.msk.f32.gmra.mrb[30].mxu1 %vm840_vm1, %v7484_v38 }
 0x2c3   : > { %5975 = vmatprep.mubr.msk.f32.mxu1 %vm840_vm1, %v7756_v41 }
 0x2c6   : > { %5976 = vmatmul.mubr.msk.f32.gmra.mrb[32].mxu1 %vm840_vm1, %v7753_v63 }
 0x2c7   : > { %5980 = vmatprep.mubr.msk.f32.mxu1 %vm840_vm1, %v7634_v27  ;;  %v2853_v27 = vrot.slane %v7753_v63, 1 }
 0x2c9   : > { %v7863_v1 = vsel %vm782_vm5, %v2843_v31, %v2853_v27 }
 0x2ca   : > { %5981 = vmatmul.mubr.msk.f32.vlgmr.msra.gmra.mrb[18].mxu1 %vm840_vm1, %v7640_v55  ;;  %v2873_v55 = vsel %vm782_vm5, %v2853_v27, %v2843_v31 }
 0x2cb   : > { %6005 = vmatpush3.msk.msra.mxu1 %vm901_vm0, %v5157_v58  ;;  %5983 = vmatprep.mubr.msk.f32.mxu1 %vm840_vm1, %v7651_v43  ;;  %v7868_v7 = vmul.f32 %v6864_v40, %v2873_v55 }
 0x2cc   : > { %6030 = vmatprep.subr.msk.mxu1 %vm901_vm0, %v5175_v61 }
 0x2ce   : > { %5984 = vmatmul.mubr.msk.f32.gmra.mrb[20].mxu1 %vm840_vm1, %v7656_v32 }
 0x2cf   : > { %5986 = vmatprep.mubr.msk.f32.mxu1 %vm840_vm1, %v7666_v56 }
 0x2d2   : > { %5987 = vmatmul.mubr.msk.f32.gmra.mrb[22].mxu1 %vm840_vm1, %v7671_v6 }
 0x2d3   : > { %5989 = vmatprep.mubr.msk.f32.mxu1 %vm840_vm1, %v7681_v49 }
 0x2d6   : > { %5990 = vmatmul.mubr.msk.f32.gmra.mrb[24].mxu1 %vm840_vm1, %v7686_v4 }
 0x2d7   : > { %5992 = vmatprep.mubr.msk.f32.mxu1 %vm840_vm1, %v7696_v11 }
 0x2da   : > { %5993 = vmatmul.mubr.msk.f32.gmra.mrb[26].mxu1 %vm840_vm1, %v7701_v18 }
 0x2db   : > { %5995 = vmatprep.mubr.msk.f32.mxu1 %vm840_vm1, %v7711_v25 }
 0x2de   : > { %5996 = vmatmul.mubr.msk.f32.gmra.mrb[28].mxu1 %vm840_vm1, %v7716_v59 }
 0x2df   : > { %5998 = vmatprep.mubr.msk.f32.mxu1 %vm840_vm1, %v7724_v52 }
 0x2e2   : > { %5999 = vmatmul.mubr.msk.f32.gmra.mrb[30].mxu1 %vm840_vm1, %v7729_v28 }
 0x2e3   : > { %6001 = vmatprep.mubr.msk.f32.mxu1 %vm840_vm1, %v7863_v1 }
 0x2e6   : > { %6002 = vmatmul.mubr.msk.f32.gmra.mrb[32].mxu1 %vm840_vm1, %v7868_v7 }
 0x2e7   : > { %6006 = vmatprep.mubr.msk.f32.mxu1 %vm840_vm1, %v7533_v46  ;;  %v2770_v46 = vmax.f32 %v7506_v36, 0.0 }
 0x2ea   : > { %6007 = vmatmul.mubr.msk.f32.vlgmr.msra.gmra.mrb[18].mxu1 %vm840_vm1, %v7545_v0  ;;  %v8104_v0 = vld [vmem:[#allocation10_spill] sm:$0xff] }
 0x2eb   : > { %6031 = vmatpush3.msk.msra.mxu1 %vm901_vm0, %v5175_v61  ;;  %6009 = vmatprep.mubr.msk.f32.mxu1 %vm840_vm1, %v7548_v37  ;;  %v2774_v37 = vmul.f32 %v2770_v46, %v8104_v0  ;;  %v2773_v10 = vmul.f32 %v2769_v33, %v8104_v0  ;;  %v6420_v61 = vld [vmem:[%s6599_s13 + $0x30] sm:$0xff] }
 0x2ec   : > { %6056 = vmatprep.subr.msk.mxu1 %vm901_vm0, %v5193_v8 }
 0x2ed   : > { %v2784_v36 = vrot.slane %v2773_v10, 7 }
 0x2ee   : > { %6010 = vmatmul.mubr.msk.f32.gmra.mrb[20].mxu1 %vm840_vm1, %v7560_v48  ;;  %v2794_v48 = vrot.slane %v2774_v37, 7 }
 0x2ef   : > { %6012 = vmatprep.mubr.msk.f32.mxu1 %vm840_vm1, %v7563_v2 }
 0x2f0   : > { %v2814_v30 = vsel %vm703_vm3, %v2794_v48, %v2784_v36 }
 0x2f1   : > { %v2833_v2 = vmul.f32 %v6620_v15, %v2814_v30  ;;  %v2844_v15 = vrot.slane %v2773_v10, 1 }
 0x2f2   : > { %6013 = vmatmul.mubr.msk.f32.gmra.mrb[22].mxu1 %vm840_vm1, %v7575_v34  ;;  %v2804_v34 = vsel %vm703_vm3, %v2784_v36, %v2794_v48 }
 0x2f3   : > { %6015 = vmatprep.mubr.msk.f32.mxu1 %vm840_vm1, %v7578_v54 }
 0x2f6   : > { %6016 = vmatmul.mubr.msk.f32.gmra.mrb[24].mxu1 %vm840_vm1, %v7590_v42 }
 0x2f7   : > { %6018 = vmatprep.mubr.msk.f32.mxu1 %vm840_vm1, %v7593_v14  ;;  %v6414_v14 = vld [vmem:[%s6599_s13] sm:$0xff] }
 0x2fa   : > { %6019 = vmatmul.mubr.msk.f32.gmra.mrb[26].mxu1 %vm840_vm1, %v7603_v12 }
 0x2fb   : > { %6021 = vmatprep.mubr.msk.f32.mxu1 %vm840_vm1, %v7606_v47 }
 0x2fe   : > { %6022 = vmatmul.mubr.msk.f32.gmra.mrb[28].mxu1 %vm840_vm1, %v7614_v20 }
 0x2ff   : > { %6024 = vmatprep.mubr.msk.f32.mxu1 %vm840_vm1, %v7775_v45 }
 0x302   : > { %6025 = vmatmul.mubr.msk.f32.gmra.mrb[30].mxu1 %vm840_vm1, %v7783_v57 }
 0x303   : > { %6027 = vmatprep.mubr.msk.f32.mxu1 %vm840_vm1, %v2833_v2 }
 0x306   : > { %6028 = vmatmul.mubr.msk.f32.gmra.mrb[32].mxu1 %vm840_vm1, %v2804_v34  ;;  %v6423_v34 = vld [vmem:[%s6599_s13 + $0x58] sm:$0xff] }
 0x307   : > { %6032 = vmatprep.mubr.msk.f32.mxu1 %vm840_vm1, %v7421_v60  ;;  %v2854_v60 = vrot.slane %v2774_v37, 1 }
 0x30a   : > { %6033 = vmatmul.mubr.msk.f32.vlgmr.msra.gmra.mrb[18].mxu1 %vm840_vm1, %v7423_v17  ;;  %v2874_v17 = vsel %vm782_vm5, %v2854_v60, %v2844_v15 }
 0x30b   : > { %6057 = vmatpush3.msk.msra.mxu1 %vm901_vm0, %v5193_v8  ;;  %6035 = vmatprep.mubr.msk.f32.mxu1 %vm840_vm1, %v7431_v44  ;;  %v2864_v44 = vsel %vm782_vm5, %v2844_v15, %v2854_v60  ;;  %v6421_v8 = vld [vmem:[%s6599_s13 + $0x48] sm:$0xff] }
 0x30e   : > { %6036 = vmatmul.mubr.msk.f32.gmra.mrb[20].mxu1 %vm840_vm1, %v7434_v51  ;;  %v2894_v51 = vmul.f32 %v6864_v40, %v2874_v17 }
 0x30f   : > { %6038 = vmatprep.mubr.msk.f32.mxu1 %vm840_vm1, %v7443_v23  ;;  %v7985_v23 = vld [vmem:[%s8081_s8] ss:$0 sm:$0xff] }
 0x312   : > { %6039 = vmatmul.mubr.msk.f32.gmra.mrb[22].mxu1 %vm840_vm1, %v7446_v24 }
 0x313   : > { %6041 = vmatprep.mubr.msk.f32.mxu1 %vm840_vm1, %v7455_v5 }
 0x316   : > { %6042 = vmatmul.mubr.msk.f32.gmra.mrb[24].mxu1 %vm840_vm1, %v7458_v9 }
 0x317   : > { %6044 = vmatprep.mubr.msk.f32.mxu1 %vm840_vm1, %v7467_v19 }
 0x31a   : > { %6045 = vmatmul.mubr.msk.f32.gmra.mrb[26].mxu1 %vm840_vm1, %v7470_v22 }
 0x31b   : > { %6047 = vmatprep.mubr.msk.f32.mxu1 %vm840_vm1, %v7481_v13  ;;  %v6413_v13 = vld [vmem:[%s6599_s13 + $0x8] sm:$0xff] }
 0x31e   : > { %6048 = vmatmul.mubr.msk.f32.gmra.mrb[28].mxu1 %vm840_vm1, %v7484_v38 }
 0x31f   : > { %6050 = vmatprep.mubr.msk.f32.mxu1 %vm840_vm1, %v7756_v41 }
 0x322   : > { %6051 = vmatmul.mubr.msk.f32.gmra.mrb[30].mxu1 %vm840_vm1, %v7753_v63 }
 0x323   : > { %6053 = vmatprep.mubr.msk.f32.mxu1 %vm840_vm1, %v2773_v10 }
 0x326   : > { %6054 = vmatmul.mubr.msk.f32.gmra.mrb[32].mxu1 %vm840_vm1, %v2774_v37  ;;  %v6422_v37 = vld [vmem:[%s6599_s13 + $0x40] sm:$0xff] }
 0x327   : > { %6058 = vmatprep.mubr.msk.f32.mxu1 %vm840_vm1, %v7651_v43 }
 0x32a   : > { %6059 = vmatmul.mubr.msk.f32.vlgmr.msra.gmra.mrb[18].mxu1 %vm840_vm1, %v7656_v32 }
 0x32b   : > { %6061 = vmatprep.mubr.msk.f32.mxu1 %vm840_vm1, %v7666_v56  ;;  %v6415_v56 = vld [vmem:[%s6599_s13 + $0x18] sm:$0xff] }
 0x32e   : > { %6062 = vmatmul.mubr.msk.f32.gmra.mrb[20].mxu1 %vm840_vm1, %v7671_v6 }
 0x32f   : > { %6064 = vmatprep.mubr.msk.f32.mxu1 %vm840_vm1, %v7681_v49 }
 0x332   : > { %6065 = vmatmul.mubr.msk.f32.gmra.mrb[22].mxu1 %vm840_vm1, %v7686_v4 }
 0x333   : > { %6067 = vmatprep.mubr.msk.f32.mxu1 %vm840_vm1, %v7696_v11 }
 0x336   : > { %6068 = vmatmul.mubr.msk.f32.gmra.mrb[24].mxu1 %vm840_vm1, %v7701_v18 }
 0x337   : > { %6070 = vmatprep.mubr.msk.f32.mxu1 %vm840_vm1, %v7711_v25  ;;  %v6417_v25 = vld [vmem:[%s6599_s13 + $0x28] sm:$0xff] }
 0x33a   : > { %6071 = vmatmul.mubr.msk.f32.gmra.mrb[26].mxu1 %vm840_vm1, %v7716_v59 }
 0x33b   : > { %6073 = vmatprep.mubr.msk.f32.mxu1 %vm840_vm1, %v7724_v52 }
 0x33e   : > { %6074 = vmatmul.mubr.msk.f32.gmra.mrb[28].mxu1 %vm840_vm1, %v7729_v28  ;;  %v6418_v28 = vld [vmem:[%s6599_s13 + $0x20] sm:$0xff] }
 0x33f   : > { %6076 = vmatprep.mubr.msk.f32.mxu1 %vm840_vm1, %v7863_v1 }
 0x342   : > { %6077 = vmatmul.mubr.msk.f32.gmra.mrb[30].mxu1 %vm840_vm1, %v7868_v7 }
 0x343   : > { %6079 = vmatprep.mubr.msk.f32.mxu1 %vm840_vm1, %v2864_v44  ;;  %v6424_v44 = vld [vmem:[%s6599_s13 + $0x50] sm:$0xff] }
 0x346   : > { %6080 = vmatmul.mubr.msk.f32.gmra.mrb[32].mxu1 %vm840_vm1, %v2894_v51 }
 0x3fd   : > { %v6060_v24 = vpop.f32.mrb[18].mxu1 }
 0x3fe   : > { %v4544_v5 = vadd.f32 %v6060_v24, %v7985_v23  ;;  %v4441_v9 = vpop.f32.mrb[19].mxu1 }
 0x3ff   : > { %v4543_v19 = vadd.f32 %v7985_v23, %v4441_v9 }
 0x400   : > { %v4560_v3 = vmax.f32 %v4544_v5, 0.0 }
 0x401   : > { %v4559_v40 = vmax.f32 %v4543_v19, 0.0  ;;  %v6063_v22 = vpop.f32.mrb[20].mxu1 }
 0x402   : > { %v4576_v38 = vadd.f32 %v6413_v13, %v4560_v3  ;;  %v4546_v54 = vadd.f32 %v6063_v22, %v7985_v23  ;;  %v4451_v42 = vpop.f32.mrb[21].mxu1  ;;  %v6425_v3 = vld [vmem:[%s6599_s13 + $0x68] sm:$0xff] }
 0x403   : > { %v4575_v12 = vadd.f32 %v6414_v14, %v4559_v40  ;;  %v4545_v47 = vadd.f32 %v7985_v23, %v4451_v42 }
 0x404   : > { %4592 = vst.msk [vmem:[%s7994_s27 + $0x8] sm:$0xff] %vm840_vm1, %v4576_v38  ;;  %v4562_v20 = vmax.f32 %v4546_v54, 0.0  ;;  %v6426_v38 = vld [vmem:[%s6599_s13 + $0x60] sm:$0xff] }
 0x405   : > { %4591 = vst.msk [vmem:[%s7994_s27] sm:$0xff] %vm840_vm1, %v4575_v12  ;;  %v4561_v43 = vmax.f32 %v4545_v47, 0.0  ;;  %v6066_v32 = vpop.f32.mrb[22].mxu1  ;;  %v6427_v47 = vld [vmem:[%s6599_s13 + $0x78] sm:$0xff] }
 0x406   : > { %v4578_v6 = vadd.f32 %v6415_v56, %v4562_v20  ;;  %v4548_v49 = vadd.f32 %v6066_v32, %v7985_v23  ;;  %v4461_v4 = vpop.f32.mrb[23].mxu1 }
 0x407   : > { %v4577_v11 = vadd.f32 %v6416_v62, %v4561_v43  ;;  %v4547_v18 = vadd.f32 %v7985_v23, %v4461_v4  ;;  %v6428_v43 = vld [vmem:[%s6599_s13 + $0x70] sm:$0xff] }
 0x408   : > { %4594 = vst.msk [vmem:[%s7994_s27 + $0x18] sm:$0xff] %vm840_vm1, %v4578_v6  ;;  %v4564_v21 = vmax.f32 %v4548_v49, 0.0 }
 0x409   : > { %4593 = vst.msk [vmem:[%s7994_s27 + $0x10] sm:$0xff] %vm840_vm1, %v4577_v11  ;;  %v4563_v29 = vmax.f32 %v4547_v18, 0.0  ;;  %v6069_v53 = vpop.f32.mrb[24].mxu1 }
 0x40a   : > { %v4580_v59 = vadd.f32 %v6417_v25, %v4564_v21  ;;  %v4550_v16 = vadd.f32 %v6069_v53, %v7985_v23  ;;  %v4471_v52 = vpop.f32.mrb[25].mxu1 }
 0x40b   : > { %v4579_v35 = vadd.f32 %v6418_v28, %v4563_v29  ;;  %v4549_v63 = vadd.f32 %v7985_v23, %v4471_v52 }
 0x40c   : > { %4596 = vst.msk [vmem:[%s7994_s27 + $0x28] sm:$0xff] %vm840_vm1, %v4580_v59  ;;  %v4566_v41 = vmax.f32 %v4550_v16, 0.0 }
 0x40d   : > { %4595 = vst.msk [vmem:[%s7994_s27 + $0x20] sm:$0xff] %vm840_vm1, %v4579_v35  ;;  %v4565_v26 = vmax.f32 %v4549_v63, 0.0  ;;  %v6072_v50 = vpop.f32.mrb[26].mxu1 }
 0x40e   : > { %v4582_v45 = vadd.f32 %v6419_v39, %v4566_v41  ;;  %v4552_v57 = vadd.f32 %v6072_v50, %v7985_v23  ;;  %v4481_v58 = vpop.f32.mrb[27].mxu1 }
 0x40f   : > { %v4581_v31 = vadd.f32 %v6420_v61, %v4565_v26  ;;  %v4551_v27 = vadd.f32 %v7985_v23, %v4481_v58 }
 0x410   : > { %4598 = vst.msk [vmem:[%s7994_s27 + $0x38] sm:$0xff] %vm840_vm1, %v4582_v45  ;;  %v4568_v55 = vmax.f32 %v4552_v57, 0.0 }
 0x411   : > { %4597 = vst.msk [vmem:[%s7994_s27 + $0x30] sm:$0xff] %vm840_vm1, %v4581_v31  ;;  %v4567_v1 = vmax.f32 %v4551_v27, 0.0  ;;  %v6075_v7 = vpop.f32.mrb[28].mxu1 }
 0x412   : > { %v4584_v46 = vadd.f32 %v6421_v8, %v4568_v55  ;;  %v4554_v33 = vadd.f32 %v6075_v7, %v7985_v23  ;;  %v4491_v0 = vpop.f32.mrb[29].mxu1 }
 0x413   : > { %v4583_v10 = vadd.f32 %v6422_v37, %v4567_v1  ;;  %v4553_v48 = vadd.f32 %v7985_v23, %v4491_v0 }
 0x414   : > { %4600 = vst.msk [vmem:[%s7994_s27 + $0x48] sm:$0xff] %vm840_vm1, %v4584_v46  ;;  %v4570_v36 = vmax.f32 %v4554_v33, 0.0 }
 0x415   : > { %4599 = vst.msk [vmem:[%s7994_s27 + $0x40] sm:$0xff] %vm840_vm1, %v4583_v10  ;;  %v4569_v30 = vmax.f32 %v4553_v48, 0.0  ;;  %v6078_v2 = vpop.f32.mrb[30].mxu1 }
 0x416   : > { %v4586_v15 = vadd.f32 %v6423_v34, %v4570_v36  ;;  %v4556_v60 = vadd.f32 %v6078_v2, %v7985_v23  ;;  %v4501_v17 = vpop.f32.mrb[31].mxu1 }
 0x417   : > { %v4585_v51 = vadd.f32 %v6424_v44, %v4569_v30  ;;  %v4555_v24 = vadd.f32 %v7985_v23, %v4501_v17 }
 0x418   : > { %4602 = vst.msk [vmem:[%s7994_s27 + $0x58] sm:$0xff] %vm840_vm1, %v4586_v15  ;;  %v4572_v5 = vmax.f32 %v4556_v60, 0.0 }
 0x419   : > { %4601 = vst.msk [vmem:[%s7994_s27 + $0x50] sm:$0xff] %vm840_vm1, %v4585_v51  ;;  %v4571_v9 = vmax.f32 %v4555_v24, 0.0  ;;  %v6081_v19 = vpop.f32.mrb[32].mxu1 }
 0x41a   : > { %v4588_v40 = vadd.f32 %v6425_v3, %v4572_v5  ;;  %v4558_v22 = vadd.f32 %v6081_v19, %v7985_v23  ;;  %v4511_v13 = vpop.f32.mrb[33].mxu1 }
 0x41b   : > { %v4587_v54 = vadd.f32 %v6426_v38, %v4571_v9  ;;  %v4557_v42 = vadd.f32 %v7985_v23, %v4511_v13 }
 0x41c   : > { %4604 = vst.msk [vmem:[%s7994_s27 + $0x68] sm:$0xff] %vm840_vm1, %v4588_v40  ;;  %v4574_v14 = vmax.f32 %v4558_v22, 0.0 }
 0x41d   : > { %4603 = vst.msk [vmem:[%s7994_s27 + $0x60] sm:$0xff] %vm840_vm1, %v4587_v54  ;;  %v4573_v12 = vmax.f32 %v4557_v42, 0.0 }
 0x41e   : > { %v4590_v20 = vadd.f32 %v6427_v47, %v4574_v14 }
 0x41f   : > { %v4589_v32 = vadd.f32 %v6428_v43, %v4573_v12 }
 0x420   : > { %4606 = vst.msk [vmem:[%s7994_s27 + $0x78] sm:$0xff] %vm840_vm1, %v4590_v20 }
 0x421   : > { %4605 = vst.msk [vmem:[%s7994_s27 + $0x70] sm:$0xff] %vm840_vm1, %v4589_v32 }
 0x422 PF: > { %s8105_s28 = sld [smem:[#allocation4_spill]]  ;;  %s8106_s30 = sld [smem:[#allocation2_spill]] }
 0x423   : > { %s8107_s10 = sld [smem:[#allocation3_spill]]  ;;  %s8108_s11 = sld [smem:[#allocation5_spill]] }
 0x424   : > { %s8109_s12 = sld [smem:[#allocation6_spill]] }
 0x428   : > { %s19_s13 = sadd.s32 1, %s8105_s28  }
 0x429   : > { %p16_p3 = scmp.ge.s32.totalorder %s19_s13, 6  }
 0x42b   :  { %18 = sbr.rel (!%p16_p3) target bundleno = 3 (0x3), region = 114 }

</bundles_post_ra>
